<compile_context>
chip_gen: v5e
topology: v5e:2x2
jax: 0.10.0
libtpu: 0.0.40
codegen_flags: <defaults>
</compile_context>

<pallas_src>
import jax
import jax.numpy as jnp
from jax import lax
from jax.experimental import pallas as pl
from jax.experimental.pallas import tpu as pltpu

EPS = 1e-5  # nn.BatchNorm2d default eps


def _vmem_capacity_bytes():
    try:
        return int(pltpu.get_tpu_info().vmem_capacity_bytes)
    except Exception:
        return 64 * 1024 * 1024  # conservative fallback (v7x per-TC VMEM)


def _band_bytes(toh, Wo, Cin, Cout):
    core = 2 * toh * Wo * 2 * Cin * 4          # f32 core input block
    outb = toh * Wo * Cout * 4                 # f32 output block
    temps = 8 * toh * Wo * 2 * Cin * 4         # parity copies + padded slabs (rough)
    return 2 * core + 2 * outb + temps         # double-buffered in/out + temporaries


def _pick_toh(Ho, Wo, Cin, Cout, budget, m_cap=2048):
    """Largest output-row tile that divides Ho, fits the VMEM budget and keeps the
    matmul M-tile (TOH*Wo) bounded; prefer 8-aligned M-tiles."""
    cands = [t for t in range(1, Ho + 1)
             if Ho % t == 0 and t * Wo <= m_cap
             and _band_bytes(t, Wo, Cin, Cout) <= budget]
    if not cands:
        return 1
    pref = [t for t in cands if (t * Wo) % 8 == 0]
    return max(pref) if pref else max(cands)


# ------------------------------ Forward pass ------------------------------- #

def downsampling_forward(x, gamma, beta, weight, bias, *, k=4, s=2, p=1):
    """x: (B, Cin, H, W) NCHW float32 -> (B, Cout, H//2, W//2) NCHW float32."""
    if not (k == 4 and s == 2 and p == 1):
        raise NotImplementedError("kernel specialised for k=4, s=2, p=1")
    B, Cin, H, W = x.shape
    Cout = weight.shape[0]
    if (H % 2) or (W % 2):
        raise NotImplementedError("even spatial dims required")  # TODO(synk): odd H/W
    Ho, Wo = H // 2, W // 2
    C2 = 2 * Cin

    vmem_budget = min(int(_vmem_capacity_bytes() * 0.75), 128 * 1024 * 1024)
    TOH = _pick_toh(Ho, Wo, Cin, Cout, vmem_budget)
    NT = Ho // TOH

    # --- BatchNorm batch statistics: ONE pass over x (sum + sum-of-squares). ---
    x32 = x.astype(jnp.float32)
    m1 = jnp.mean(x32, axis=(0, 2, 3))
    m2 = jnp.mean(x32 * x32, axis=(0, 2, 3))
    var = jnp.maximum(m2 - m1 * m1, 0.0)
    scale = gamma.astype(jnp.float32) * lax.rsqrt(var + EPS)   # BN(x) = x*scale + shift
    shift = beta.astype(jnp.float32) - m1 * scale
    scale2 = jnp.tile(scale, 2).reshape(1, C2)   # lanes: [even-col ch | odd-col ch]
    shift2 = jnp.tile(shift, 2).reshape(1, C2)

    # --- layout: NCHW -> NHWC transpose; fold W as (Wo, 2*Cin) and flatten (B,H)
    #     (free reshapes). NO conv zero-padding is materialised in HBM.
    x_nhwc = jnp.transpose(x32, (0, 2, 3, 1))
    x_flat = x_nhwc.reshape(B * H, Wo, C2)

    # --- conv weight prepack: one (2*Cin, Cout) bf16 block per (kh, wq-shift). ---
    w_t = jnp.transpose(weight.astype(jnp.float32), (2, 3, 1, 0))   # (kh, kw, Cin, Cout)
    zc = jnp.zeros((Cin, Cout), jnp.float32)
    blocks = []
    for kh in range(4):
        blocks.append(jnp.concatenate([zc, w_t[kh, 0]], axis=0))            # wq = ow-1
        blocks.append(jnp.concatenate([w_t[kh, 1], w_t[kh, 2]], axis=0))    # wq = ow
        blocks.append(jnp.concatenate([w_t[kh, 3], zc], axis=0))            # wq = ow+1
    wpack = jnp.stack(blocks, axis=0).astype(jnp.bfloat16)                  # (12, 2C, Cout)
    bias2 = bias.astype(jnp.float32).reshape(1, Cout)

    def kernel(scale_ref, shift_ref, w_ref, bias_ref, xc_ref, xany_ref, o_ref,
               halo_ref, sem_ref):
        b = pl.program_id(0)
        t = pl.program_id(1)

        # ---- kick off the 2 halo-row DMAs (rows just above/below the core band) ----
        row0 = b * H + t * (2 * TOH)                    # first core row (flat index)
        top_row = jnp.maximum(row0 - 1, b * H)          # clamp inside this batch
        bot_row = jnp.minimum(row0 + 2 * TOH, b * H + H - 1)
        cp_top = pltpu.make_async_copy(xany_ref.at[top_row], halo_ref.at[0], sem_ref.at[0])
        cp_bot = pltpu.make_async_copy(xany_ref.at[bot_row], halo_ref.at[1], sem_ref.at[1])
        cp_top.start()
        cp_bot.start()

        # ---- fused BatchNorm affine + ReLU on the core band (halo DMA in flight) ----
        sc = scale_ref[...]
        sh = shift_ref[...]
        y = jnp.maximum(xc_ref[...] * sc + sh, 0.0)     # (2*TOH, Wo, 2C) f32

        cp_top.wait()
        cp_bot.wait()
        hy = jnp.maximum(halo_ref[...] * sc + sh, 0.0)  # (2, Wo, 2C)
        # conv zero-ring along H: halo rows outside the image become exactly 0
        y_top = hy[0:1] * jnp.where(t > 0, 1.0, 0.0)
        y_bot = hy[1:2] * jnp.where(t < NT - 1, 1.0, 0.0)

        # ---- stride-2 row gather = parity split of the core band ----
        yg = y.reshape(TOH, 2, Wo, C2)
        ev = yg[:, 0]                                   # input rows 2*oh   (kh = 1)
        od = yg[:, 1]                                   # input rows 2*oh+1 (kh = 2)
        rows = [None] * 4
        rows[1] = ev
        rows[2] = od
        if TOH > 1:
            rows[0] = jnp.concatenate([y_top, od[:TOH - 1]], axis=0)   # rows 2*oh-1
            rows[3] = jnp.concatenate([ev[1:], y_bot], axis=0)         # rows 2*oh+2
        else:
            rows[0] = y_top
            rows[3] = y_bot

        # ---- conv = 12 partial MXU matmuls (K = 2*Cin each), f32 accumulation ----
        zcol = jnp.zeros((TOH, 1, C2), jnp.float32)     # conv zero-ring along W
        acc = jnp.zeros((TOH * Wo, Cout), jnp.float32)
        for kh in range(4):
            padw = jnp.concatenate([zcol, rows[kh], zcol], axis=1)     # (TOH, Wo+2, 2C)
            for j in range(3):                                         # wq-shift -1, 0, +1
                slab = padw[:, j:j + Wo, :].reshape(TOH * Wo, C2)
                acc = acc + jnp.dot(slab.astype(jnp.bfloat16), w_ref[kh * 3 + j],
                                    preferred_element_type=jnp.float32)
        o_ref[...] = acc + bias_ref[...]

    out_flat = pl.pallas_call(
        kernel,
        out_shape=jax.ShapeDtypeStruct((B * Ho * Wo, Cout), jnp.float32),
        grid=(B, NT),
        in_specs=[
            pl.BlockSpec((1, C2), lambda b, t: (0, 0)),
            pl.BlockSpec((1, C2), lambda b, t: (0, 0)),
            pl.BlockSpec((12, C2, Cout), lambda b, t: (0, 0, 0)),
            pl.BlockSpec((1, Cout), lambda b, t: (0, 0)),
            # core input band: disjoint 2*TOH-row blocks, auto-pipelined by Pallas
            pl.BlockSpec((2 * TOH, Wo, C2), lambda b, t: (b * NT + t, 0, 0)),
            # same array again, left in HBM for the manual halo-row DMAs
            pl.BlockSpec(memory_space=pl.ANY),
        ],
        out_specs=pl.BlockSpec((TOH * Wo, Cout), lambda b, t: (b * NT + t, 0)),
        scratch_shapes=[
            pltpu.VMEM((2, Wo, C2), jnp.float32),       # halo rows (above/below band)
            pltpu.SemaphoreType.DMA((2,)),
        ],
        compiler_params=pltpu.CompilerParams(
            dimension_semantics=("parallel", "parallel"),
            vmem_limit_bytes=vmem_budget,
        ),
    )(scale2, shift2, wpack, bias2, x_flat, x_flat)

    out = out_flat.reshape(B, Ho, Wo, Cout)
    return jnp.transpose(out, (0, 3, 1, 2))             # NHWC -> NCHW


# ---------------------------- Pure-JAX reference --------------------------- #

def reference(x, gamma, beta, weight, bias):
    mean = jnp.mean(x, axis=(0, 2, 3), keepdims=True)
    var = jnp.mean((x - mean) ** 2, axis=(0, 2, 3), keepdims=True)
    y = (x - mean) / jnp.sqrt(var + EPS)
    y = y * gamma.reshape(1, -1, 1, 1) + beta.reshape(1, -1, 1, 1)
    y = jnp.maximum(y, 0.0)
    out = lax.conv_general_dilated(
        y, weight, window_strides=(2, 2), padding=((1, 1), (1, 1)),
        dimension_numbers=("NCHW", "OIHW", "NCHW"))
    return out + bias.reshape(1, -1, 1, 1)


if __name__ == "__main__":
    B, Cin, H, W = 2, 4, 16, 16
    Cout, K = 8, 4

    key = jax.random.PRNGKey(0)
    kx, kg, kb, kw, kbias = jax.random.split(key, 5)

    x = jax.random.normal(kx, (B, Cin, H, W), dtype=jnp.float32)
    gamma = 1.0 + 0.1 * jax.random.normal(kg, (Cin,), dtype=jnp.float32)
    beta = 0.1 * jax.random.normal(kb, (Cin,), dtype=jnp.float32)
    weight = 0.1 * jax.random.normal(kw, (Cout, Cin, K, K), dtype=jnp.float32)
    bias = 0.1 * jax.random.normal(kbias, (Cout,), dtype=jnp.float32)

    fwd = jax.jit(downsampling_forward)
    out = jax.block_until_ready(fwd(x, gamma, beta, weight, bias))
    ref = jax.block_until_ready(reference(x, gamma, beta, weight, bias))

    assert out.shape == (B, Cout, H // 2, W // 2), out.shape
    err = float(jnp.max(jnp.abs(out - ref)))
    # bf16 MXU matmuls + one-pass BN variance (per perf review) -> tolerance relaxed
    # vs. the all-f32 reference.
    assert jnp.allclose(out, ref, atol=3e-2, rtol=3e-2), err
    print("KERNEL_OK")
</pallas_src>

<mosaic_0001>
module attributes {stable_mosaic.version = 11 : i64} {
  func.func @kernel(%arg0: i32, %arg1: i32, %arg2: memref<1x8xf32, #tpu.memory_space<vmem>>, %arg3: memref<1x8xf32, #tpu.memory_space<vmem>>, %arg4: memref<12x8x8xbf16, #tpu.memory_space<vmem>>, %arg5: memref<1x8xf32, #tpu.memory_space<vmem>>, %arg6: memref<16x8x8xf32, #tpu.memory_space<vmem>>, %arg7: memref<32x8x8xf32, #tpu.memory_space<any>>, %arg8: memref<64x8xf32, #tpu.memory_space<vmem>>, %arg9: memref<2x8x8xf32, #tpu.memory_space<vmem>>, %arg10: memref<2x!tpu.dma_semaphore, #tpu.memory_space<semaphore_mem>>) attributes {dimension_semantics = [#tpu.dimension_semantics<parallel>, #tpu.dimension_semantics<parallel>], iteration_bounds = array<i64: 2, 1>, scalar_prefetch = 0 : i64, scratch_operands = 2 : i64, tpu.core_type = #tpu.core_type<tc>, window_params = [{pipeline_mode = #tpu.pipeline_mode<synchronous>, transform_indices = @transform_0, window_bounds = array<i64: 1, 8>}, {pipeline_mode = #tpu.pipeline_mode<synchronous>, transform_indices = @transform_1, window_bounds = array<i64: 1, 8>}, {pipeline_mode = #tpu.pipeline_mode<synchronous>, transform_indices = @transform_2, window_bounds = array<i64: 12, 8, 8>}, {pipeline_mode = #tpu.pipeline_mode<synchronous>, transform_indices = @transform_3, window_bounds = array<i64: 1, 8>}, {transform_indices = @transform_4, window_bounds = array<i64: 16, 8, 8>}, {}, {transform_indices = @transform_6, window_bounds = array<i64: 64, 8>}]} {
    %c16_i32 = arith.constant 16 : i32
    %0 = arith.muli %arg0, %c16_i32 : i32
    %c16_i32_0 = arith.constant 16 : i32
    %1 = arith.muli %arg1, %c16_i32_0 : i32
    %2 = arith.addi %0, %1 : i32
    %c1_i32 = arith.constant 1 : i32
    %3 = arith.subi %2, %c1_i32 : i32
    %c16_i32_1 = arith.constant 16 : i32
    %4 = arith.muli %arg0, %c16_i32_1 : i32
    %5 = arith.maxsi %3, %4 : i32
    %c16_i32_2 = arith.constant 16 : i32
    %6 = arith.addi %2, %c16_i32_2 : i32
    %c16_i32_3 = arith.constant 16 : i32
    %7 = arith.muli %arg0, %c16_i32_3 : i32
    %c16_i32_4 = arith.constant 16 : i32
    %8 = arith.addi %7, %c16_i32_4 : i32
    %c1_i32_5 = arith.constant 1 : i32
    %9 = arith.subi %8, %c1_i32_5 : i32
    %10 = arith.minsi %6, %9 : i32
    %c0_i32 = arith.constant 0 : i32
    %c0_i32_6 = arith.constant 0 : i32
    %c0_i32_7 = arith.constant 0 : i32
    %c0_i32_8 = arith.constant 0 : i32
    %11 = tpu.memref_slice %arg7[%5, %c0_i32_7, %c0_i32_8] : memref<32x8x8xf32, #tpu.memory_space<any>> -> memref<1x8x8xf32, #tpu.memory_space<any>>
    %12 = tpu.memref_squeeze %11 : memref<1x8x8xf32, #tpu.memory_space<any>> -> memref<8x8xf32, #tpu.memory_space<any>>
    %c0_i32_9 = arith.constant 0 : i32
    %c0_i32_10 = arith.constant 0 : i32
    %13 = tpu.memref_slice %arg9[%c0_i32, %c0_i32_9, %c0_i32_10] : memref<2x8x8xf32, #tpu.memory_space<vmem>> -> memref<1x8x8xf32, #tpu.memory_space<vmem>>
    %14 = tpu.memref_squeeze %13 : memref<1x8x8xf32, #tpu.memory_space<vmem>> -> memref<8x8xf32, #tpu.memory_space<vmem>>
    %15 = tpu.memref_slice %arg10[%c0_i32_6] : memref<2x!tpu.dma_semaphore, #tpu.memory_space<semaphore_mem>> -> memref<1x!tpu.dma_semaphore, #tpu.memory_space<semaphore_mem>>
    %16 = tpu.memref_squeeze %15 : memref<1x!tpu.dma_semaphore, #tpu.memory_space<semaphore_mem>> -> memref<!tpu.dma_semaphore, #tpu.memory_space<semaphore_mem>>
    tpu.enqueue_dma source(%12 : memref<8x8xf32, #tpu.memory_space<any>>) target(%14 : memref<8x8xf32, #tpu.memory_space<vmem>>) target_semaphore(%16 : memref<!tpu.dma_semaphore, #tpu.memory_space<semaphore_mem>>)
    %c1_i32_11 = arith.constant 1 : i32
    %c1_i32_12 = arith.constant 1 : i32
    %c0_i32_13 = arith.constant 0 : i32
    %c0_i32_14 = arith.constant 0 : i32
    %17 = tpu.memref_slice %arg7[%10, %c0_i32_13, %c0_i32_14] : memref<32x8x8xf32, #tpu.memory_space<any>> -> memref<1x8x8xf32, #tpu.memory_space<any>>
    %18 = tpu.memref_squeeze %17 : memref<1x8x8xf32, #tpu.memory_space<any>> -> memref<8x8xf32, #tpu.memory_space<any>>
    %c0_i32_15 = arith.constant 0 : i32
    %c0_i32_16 = arith.constant 0 : i32
    %19 = tpu.memref_slice %arg9[%c1_i32_11, %c0_i32_15, %c0_i32_16] : memref<2x8x8xf32, #tpu.memory_space<vmem>> -> memref<1x8x8xf32, #tpu.memory_space<vmem>>
    %20 = tpu.memref_squeeze %19 : memref<1x8x8xf32, #tpu.memory_space<vmem>> -> memref<8x8xf32, #tpu.memory_space<vmem>>
    %21 = tpu.memref_slice %arg10[%c1_i32_12] : memref<2x!tpu.dma_semaphore, #tpu.memory_space<semaphore_mem>> -> memref<1x!tpu.dma_semaphore, #tpu.memory_space<semaphore_mem>>
    %22 = tpu.memref_squeeze %21 : memref<1x!tpu.dma_semaphore, #tpu.memory_space<semaphore_mem>> -> memref<!tpu.dma_semaphore, #tpu.memory_space<semaphore_mem>>
    tpu.enqueue_dma source(%18 : memref<8x8xf32, #tpu.memory_space<any>>) target(%20 : memref<8x8xf32, #tpu.memory_space<vmem>>) target_semaphore(%22 : memref<!tpu.dma_semaphore, #tpu.memory_space<semaphore_mem>>)
    %c0 = arith.constant 0 : index
    %c0_17 = arith.constant 0 : index
    %23 = vector.load %arg2[%c0, %c0_17] : memref<1x8xf32, #tpu.memory_space<vmem>>, vector<1x8xf32>
    %c0_18 = arith.constant 0 : index
    %c0_19 = arith.constant 0 : index
    %24 = vector.load %arg3[%c0_18, %c0_19] : memref<1x8xf32, #tpu.memory_space<vmem>>, vector<1x8xf32>
    %c0_20 = arith.constant 0 : index
    %c0_21 = arith.constant 0 : index
    %c0_22 = arith.constant 0 : index
    %25 = vector.load %arg6[%c0_20, %c0_21, %c0_22] : memref<16x8x8xf32, #tpu.memory_space<vmem>>, vector<16x8x8xf32>
    %26 = vector.shape_cast %23 : vector<1x8xf32> to vector<1x1x8xf32>
    %27 = vector.broadcast %26 : vector<1x1x8xf32> to vector<16x8x8xf32>
    %28 = arith.mulf %25, %27 : vector<16x8x8xf32>
    %29 = vector.shape_cast %24 : vector<1x8xf32> to vector<1x1x8xf32>
    %30 = vector.broadcast %29 : vector<1x1x8xf32> to vector<16x8x8xf32>
    %31 = arith.addf %28, %30 : vector<16x8x8xf32>
    %cst = arith.constant 0.000000e+00 : f32
    %32 = vector.broadcast %cst : f32 to vector<16x8x8xf32>
    %33 = arith.maximumf %31, %32 : vector<16x8x8xf32>
    %c0_i32_23 = arith.constant 0 : i32
    %c0_i32_24 = arith.constant 0 : i32
    %c0_i32_25 = arith.constant 0 : i32
    %c0_i32_26 = arith.constant 0 : i32
    %34 = tpu.memref_slice %arg7[%5, %c0_i32_25, %c0_i32_26] : memref<32x8x8xf32, #tpu.memory_space<any>> -> memref<1x8x8xf32, #tpu.memory_space<any>>
    %35 = tpu.memref_squeeze %34 : memref<1x8x8xf32, #tpu.memory_space<any>> -> memref<8x8xf32, #tpu.memory_space<any>>
    %c0_i32_27 = arith.constant 0 : i32
    %c0_i32_28 = arith.constant 0 : i32
    %36 = tpu.memref_slice %arg9[%c0_i32_23, %c0_i32_27, %c0_i32_28] : memref<2x8x8xf32, #tpu.memory_space<vmem>> -> memref<1x8x8xf32, #tpu.memory_space<vmem>>
    %37 = tpu.memref_squeeze %36 : memref<1x8x8xf32, #tpu.memory_space<vmem>> -> memref<8x8xf32, #tpu.memory_space<vmem>>
    %38 = tpu.memref_slice %arg10[%c0_i32_24] : memref<2x!tpu.dma_semaphore, #tpu.memory_space<semaphore_mem>> -> memref<1x!tpu.dma_semaphore, #tpu.memory_space<semaphore_mem>>
    %39 = tpu.memref_squeeze %38 : memref<1x!tpu.dma_semaphore, #tpu.memory_space<semaphore_mem>> -> memref<!tpu.dma_semaphore, #tpu.memory_space<semaphore_mem>>
    tpu.wait_dma2 semaphore(%39 : memref<!tpu.dma_semaphore, #tpu.memory_space<semaphore_mem>>) src(%35 : memref<8x8xf32, #tpu.memory_space<any>>) dst(%37 : memref<8x8xf32, #tpu.memory_space<vmem>>)
    %c1_i32_29 = arith.constant 1 : i32
    %c1_i32_30 = arith.constant 1 : i32
    %c0_i32_31 = arith.constant 0 : i32
    %c0_i32_32 = arith.constant 0 : i32
    %40 = tpu.memref_slice %arg7[%10, %c0_i32_31, %c0_i32_32] : memref<32x8x8xf32, #tpu.memory_space<any>> -> memref<1x8x8xf32, #tpu.memory_space<any>>
    %41 = tpu.memref_squeeze %40 : memref<1x8x8xf32, #tpu.memory_space<any>> -> memref<8x8xf32, #tpu.memory_space<any>>
    %c0_i32_33 = arith.constant 0 : i32
    %c0_i32_34 = arith.constant 0 : i32
    %42 = tpu.memref_slice %arg9[%c1_i32_29, %c0_i32_33, %c0_i32_34] : memref<2x8x8xf32, #tpu.memory_space<vmem>> -> memref<1x8x8xf32, #tpu.memory_space<vmem>>
    %43 = tpu.memref_squeeze %42 : memref<1x8x8xf32, #tpu.memory_space<vmem>> -> memref<8x8xf32, #tpu.memory_space<vmem>>
    %44 = tpu.memref_slice %arg10[%c1_i32_30] : memref<2x!tpu.dma_semaphore, #tpu.memory_space<semaphore_mem>> -> memref<1x!tpu.dma_semaphore, #tpu.memory_space<semaphore_mem>>
    %45 = tpu.memref_squeeze %44 : memref<1x!tpu.dma_semaphore, #tpu.memory_space<semaphore_mem>> -> memref<!tpu.dma_semaphore, #tpu.memory_space<semaphore_mem>>
    tpu.wait_dma2 semaphore(%45 : memref<!tpu.dma_semaphore, #tpu.memory_space<semaphore_mem>>) src(%41 : memref<8x8xf32, #tpu.memory_space<any>>) dst(%43 : memref<8x8xf32, #tpu.memory_space<vmem>>)
    %c0_35 = arith.constant 0 : index
    %c0_36 = arith.constant 0 : index
    %c0_37 = arith.constant 0 : index
    %46 = vector.load %arg9[%c0_35, %c0_36, %c0_37] : memref<2x8x8xf32, #tpu.memory_space<vmem>>, vector<2x8x8xf32>
    %47 = vector.shape_cast %23 : vector<1x8xf32> to vector<1x1x8xf32>
    %48 = vector.broadcast %47 : vector<1x1x8xf32> to vector<2x8x8xf32>
    %49 = arith.mulf %46, %48 : vector<2x8x8xf32>
    %50 = vector.shape_cast %24 : vector<1x8xf32> to vector<1x1x8xf32>
    %51 = vector.broadcast %50 : vector<1x1x8xf32> to vector<2x8x8xf32>
    %52 = arith.addf %49, %51 : vector<2x8x8xf32>
    %cst_38 = arith.constant 0.000000e+00 : f32
    %53 = vector.broadcast %cst_38 : f32 to vector<2x8x8xf32>
    %54 = arith.maximumf %52, %53 : vector<2x8x8xf32>
    %55 = vector.extract_strided_slice %54 {offsets = [0, 0, 0], sizes = [1, 8, 8], strides = [1, 1, 1]} : vector<2x8x8xf32> to vector<1x8x8xf32>
    %c0_i32_39 = arith.constant 0 : i32
    %56 = arith.cmpi sgt, %arg1, %c0_i32_39 : i32
    %cst_40 = arith.constant 1.000000e+00 : f32
    %cst_41 = arith.constant 0.000000e+00 : f32
    %57 = arith.select %56, %cst_40, %cst_41 : f32
    %58 = vector.broadcast %57 : f32 to vector<1x8x8xf32>
    %59 = arith.mulf %55, %58 : vector<1x8x8xf32>
    %60 = vector.extract_strided_slice %54 {offsets = [1, 0, 0], sizes = [1, 8, 8], strides = [1, 1, 1]} : vector<2x8x8xf32> to vector<1x8x8xf32>
    %c0_i32_42 = arith.constant 0 : i32
    %61 = arith.cmpi slt, %arg1, %c0_i32_42 : i32
    %cst_43 = arith.constant 1.000000e+00 : f32
    %cst_44 = arith.constant 0.000000e+00 : f32
    %62 = arith.select %61, %cst_43, %cst_44 : f32
    %63 = vector.broadcast %62 : f32 to vector<1x8x8xf32>
    %64 = arith.mulf %60, %63 : vector<1x8x8xf32>
    %65 = vector.shape_cast %33 : vector<16x8x8xf32> to vector<8x2x8x8xf32>
    %66 = vector.extract_strided_slice %65 {offsets = [0, 0, 0, 0], sizes = [8, 1, 8, 8], strides = [1, 1, 1, 1]} : vector<8x2x8x8xf32> to vector<8x1x8x8xf32>
    %67 = vector.shape_cast %66 : vector<8x1x8x8xf32> to vector<8x8x8xf32>
    %68 = vector.extract_strided_slice %65 {offsets = [0, 1, 0, 0], sizes = [8, 1, 8, 8], strides = [1, 1, 1, 1]} : vector<8x2x8x8xf32> to vector<8x1x8x8xf32>
    %69 = vector.shape_cast %68 : vector<8x1x8x8xf32> to vector<8x8x8xf32>
    %70 = vector.extract_strided_slice %69 {offsets = [0, 0, 0], sizes = [7, 8, 8], strides = [1, 1, 1]} : vector<8x8x8xf32> to vector<7x8x8xf32>
    %71 = tpu.concatenate %59, %70 in 0 : vector<1x8x8xf32>, vector<7x8x8xf32> -> vector<8x8x8xf32>
    %72 = vector.extract_strided_slice %67 {offsets = [1, 0, 0], sizes = [7, 8, 8], strides = [1, 1, 1]} : vector<8x8x8xf32> to vector<7x8x8xf32>
    %73 = tpu.concatenate %72, %64 in 0 : vector<7x8x8xf32>, vector<1x8x8xf32> -> vector<8x8x8xf32>
    %cst_45 = arith.constant 0.000000e+00 : f32
    %74 = vector.broadcast %cst_45 : f32 to vector<8x1x8xf32>
    %cst_46 = arith.constant 0.000000e+00 : f32
    %75 = vector.broadcast %cst_46 : f32 to vector<64x8xf32>
    %76 = tpu.concatenate %74, %71, %74 in 1 : vector<8x1x8xf32>, vector<8x8x8xf32>, vector<8x1x8xf32> -> vector<8x10x8xf32>
    %77 = vector.extract_strided_slice %76 {offsets = [0, 0, 0], sizes = [8, 8, 8], strides = [1, 1, 1]} : vector<8x10x8xf32> to vector<8x8x8xf32>
    %78 = vector.shape_cast %77 : vector<8x8x8xf32> to vector<64x8xf32>
    %79 = arith.truncf %78 : vector<64x8xf32> to vector<64x8xbf16>
    %c0_47 = arith.constant 0 : index
    %c0_48 = arith.constant 0 : index
    %c0_49 = arith.constant 0 : index
    %80 = vector.load %arg4[%c0_47, %c0_48, %c0_49] : memref<12x8x8xbf16, #tpu.memory_space<vmem>>, vector<1x8x8xbf16>
    %81 = vector.shape_cast %80 : vector<1x8x8xbf16> to vector<8x8xbf16>
    %cst_50 = arith.constant dense<0.000000e+00> : vector<64x8xf32>
    %82 = tpu.matmul %79, %81, %cst_50 {dimension_numbers = #tpu.dot_dimension_numbers<[1], [0], [0], [1], [0, 0, 1, 1], [], []>} : vector<64x8xbf16>, vector<8x8xbf16>, vector<64x8xf32> -> vector<64x8xf32>
    %83 = arith.addf %75, %82 : vector<64x8xf32>
    %84 = vector.extract_strided_slice %76 {offsets = [0, 1, 0], sizes = [8, 8, 8], strides = [1, 1, 1]} : vector<8x10x8xf32> to vector<8x8x8xf32>
    %85 = vector.shape_cast %84 : vector<8x8x8xf32> to vector<64x8xf32>
    %86 = arith.truncf %85 : vector<64x8xf32> to vector<64x8xbf16>
    %c1 = arith.constant 1 : index
    %c0_51 = arith.constant 0 : index
    %c0_52 = arith.constant 0 : index
    %87 = vector.load %arg4[%c1, %c0_51, %c0_52] : memref<12x8x8xbf16, #tpu.memory_space<vmem>>, vector<1x8x8xbf16>
    %88 = vector.shape_cast %87 : vector<1x8x8xbf16> to vector<8x8xbf16>
    %cst_53 = arith.constant dense<0.000000e+00> : vector<64x8xf32>
    %89 = tpu.matmul %86, %88, %cst_53 {dimension_numbers = #tpu.dot_dimension_numbers<[1], [0], [0], [1], [0, 0, 1, 1], [], []>} : vector<64x8xbf16>, vector<8x8xbf16>, vector<64x8xf32> -> vector<64x8xf32>
    %90 = arith.addf %83, %89 : vector<64x8xf32>
    %91 = vector.extract_strided_slice %76 {offsets = [0, 2, 0], sizes = [8, 8, 8], strides = [1, 1, 1]} : vector<8x10x8xf32> to vector<8x8x8xf32>
    %92 = vector.shape_cast %91 : vector<8x8x8xf32> to vector<64x8xf32>
    %93 = arith.truncf %92 : vector<64x8xf32> to vector<64x8xbf16>
    %c2 = arith.constant 2 : index
    %c0_54 = arith.constant 0 : index
    %c0_55 = arith.constant 0 : index
    %94 = vector.load %arg4[%c2, %c0_54, %c0_55] : memref<12x8x8xbf16, #tpu.memory_space<vmem>>, vector<1x8x8xbf16>
    %95 = vector.shape_cast %94 : vector<1x8x8xbf16> to vector<8x8xbf16>
    %cst_56 = arith.constant dense<0.000000e+00> : vector<64x8xf32>
    %96 = tpu.matmul %93, %95, %cst_56 {dimension_numbers = #tpu.dot_dimension_numbers<[1], [0], [0], [1], [0, 0, 1, 1], [], []>} : vector<64x8xbf16>, vector<8x8xbf16>, vector<64x8xf32> -> vector<64x8xf32>
    %97 = arith.addf %90, %96 : vector<64x8xf32>
    %98 = tpu.concatenate %74, %67, %74 in 1 : vector<8x1x8xf32>, vector<8x8x8xf32>, vector<8x1x8xf32> -> vector<8x10x8xf32>
    %99 = vector.extract_strided_slice %98 {offsets = [0, 0, 0], sizes = [8, 8, 8], strides = [1, 1, 1]} : vector<8x10x8xf32> to vector<8x8x8xf32>
    %100 = vector.shape_cast %99 : vector<8x8x8xf32> to vector<64x8xf32>
    %101 = arith.truncf %100 : vector<64x8xf32> to vector<64x8xbf16>
    %c3 = arith.constant 3 : index
    %c0_57 = arith.constant 0 : index
    %c0_58 = arith.constant 0 : index
    %102 = vector.load %arg4[%c3, %c0_57, %c0_58] : memref<12x8x8xbf16, #tpu.memory_space<vmem>>, vector<1x8x8xbf16>
    %103 = vector.shape_cast %102 : vector<1x8x8xbf16> to vector<8x8xbf16>
    %cst_59 = arith.constant dense<0.000000e+00> : vector<64x8xf32>
    %104 = tpu.matmul %101, %103, %cst_59 {dimension_numbers = #tpu.dot_dimension_numbers<[1], [0], [0], [1], [0, 0, 1, 1], [], []>} : vector<64x8xbf16>, vector<8x8xbf16>, vector<64x8xf32> -> vector<64x8xf32>
    %105 = arith.addf %97, %104 : vector<64x8xf32>
    %106 = vector.extract_strided_slice %98 {offsets = [0, 1, 0], sizes = [8, 8, 8], strides = [1, 1, 1]} : vector<8x10x8xf32> to vector<8x8x8xf32>
    %107 = vector.shape_cast %106 : vector<8x8x8xf32> to vector<64x8xf32>
    %108 = arith.truncf %107 : vector<64x8xf32> to vector<64x8xbf16>
    %c4 = arith.constant 4 : index
    %c0_60 = arith.constant 0 : index
    %c0_61 = arith.constant 0 : index
    %109 = vector.load %arg4[%c4, %c0_60, %c0_61] : memref<12x8x8xbf16, #tpu.memory_space<vmem>>, vector<1x8x8xbf16>
    %110 = vector.shape_cast %109 : vector<1x8x8xbf16> to vector<8x8xbf16>
    %cst_62 = arith.constant dense<0.000000e+00> : vector<64x8xf32>
    %111 = tpu.matmul %108, %110, %cst_62 {dimension_numbers = #tpu.dot_dimension_numbers<[1], [0], [0], [1], [0, 0, 1, 1], [], []>} : vector<64x8xbf16>, vector<8x8xbf16>, vector<64x8xf32> -> vector<64x8xf32>
    %112 = arith.addf %105, %111 : vector<64x8xf32>
    %113 = vector.extract_strided_slice %98 {offsets = [0, 2, 0], sizes = [8, 8, 8], strides = [1, 1, 1]} : vector<8x10x8xf32> to vector<8x8x8xf32>
    %114 = vector.shape_cast %113 : vector<8x8x8xf32> to vector<64x8xf32>
    %115 = arith.truncf %114 : vector<64x8xf32> to vector<64x8xbf16>
    %c5 = arith.constant 5 : index
    %c0_63 = arith.constant 0 : index
    %c0_64 = arith.constant 0 : index
    %116 = vector.load %arg4[%c5, %c0_63, %c0_64] : memref<12x8x8xbf16, #tpu.memory_space<vmem>>, vector<1x8x8xbf16>
    %117 = vector.shape_cast %116 : vector<1x8x8xbf16> to vector<8x8xbf16>
    %cst_65 = arith.constant dense<0.000000e+00> : vector<64x8xf32>
    %118 = tpu.matmul %115, %117, %cst_65 {dimension_numbers = #tpu.dot_dimension_numbers<[1], [0], [0], [1], [0, 0, 1, 1], [], []>} : vector<64x8xbf16>, vector<8x8xbf16>, vector<64x8xf32> -> vector<64x8xf32>
    %119 = arith.addf %112, %118 : vector<64x8xf32>
    %120 = tpu.concatenate %74, %69, %74 in 1 : vector<8x1x8xf32>, vector<8x8x8xf32>, vector<8x1x8xf32> -> vector<8x10x8xf32>
    %121 = vector.extract_strided_slice %120 {offsets = [0, 0, 0], sizes = [8, 8, 8], strides = [1, 1, 1]} : vector<8x10x8xf32> to vector<8x8x8xf32>
    %122 = vector.shape_cast %121 : vector<8x8x8xf32> to vector<64x8xf32>
    %123 = arith.truncf %122 : vector<64x8xf32> to vector<64x8xbf16>
    %c6 = arith.constant 6 : index
    %c0_66 = arith.constant 0 : index
    %c0_67 = arith.constant 0 : index
    %124 = vector.load %arg4[%c6, %c0_66, %c0_67] : memref<12x8x8xbf16, #tpu.memory_space<vmem>>, vector<1x8x8xbf16>
    %125 = vector.shape_cast %124 : vector<1x8x8xbf16> to vector<8x8xbf16>
    %cst_68 = arith.constant dense<0.000000e+00> : vector<64x8xf32>
    %126 = tpu.matmul %123, %125, %cst_68 {dimension_numbers = #tpu.dot_dimension_numbers<[1], [0], [0], [1], [0, 0, 1, 1], [], []>} : vector<64x8xbf16>, vector<8x8xbf16>, vector<64x8xf32> -> vector<64x8xf32>
    %127 = arith.addf %119, %126 : vector<64x8xf32>
    %128 = vector.extract_strided_slice %120 {offsets = [0, 1, 0], sizes = [8, 8, 8], strides = [1, 1, 1]} : vector<8x10x8xf32> to vector<8x8x8xf32>
    %129 = vector.shape_cast %128 : vector<8x8x8xf32> to vector<64x8xf32>
    %130 = arith.truncf %129 : vector<64x8xf32> to vector<64x8xbf16>
    %c7 = arith.constant 7 : index
    %c0_69 = arith.constant 0 : index
    %c0_70 = arith.constant 0 : index
    %131 = vector.load %arg4[%c7, %c0_69, %c0_70] : memref<12x8x8xbf16, #tpu.memory_space<vmem>>, vector<1x8x8xbf16>
    %132 = vector.shape_cast %131 : vector<1x8x8xbf16> to vector<8x8xbf16>
    %cst_71 = arith.constant dense<0.000000e+00> : vector<64x8xf32>
    %133 = tpu.matmul %130, %132, %cst_71 {dimension_numbers = #tpu.dot_dimension_numbers<[1], [0], [0], [1], [0, 0, 1, 1], [], []>} : vector<64x8xbf16>, vector<8x8xbf16>, vector<64x8xf32> -> vector<64x8xf32>
    %134 = arith.addf %127, %133 : vector<64x8xf32>
    %135 = vector.extract_strided_slice %120 {offsets = [0, 2, 0], sizes = [8, 8, 8], strides = [1, 1, 1]} : vector<8x10x8xf32> to vector<8x8x8xf32>
    %136 = vector.shape_cast %135 : vector<8x8x8xf32> to vector<64x8xf32>
    %137 = arith.truncf %136 : vector<64x8xf32> to vector<64x8xbf16>
    %c8 = arith.constant 8 : index
    %c0_72 = arith.constant 0 : index
    %c0_73 = arith.constant 0 : index
    %138 = vector.load %arg4[%c8, %c0_72, %c0_73] : memref<12x8x8xbf16, #tpu.memory_space<vmem>>, vector<1x8x8xbf16>
    %139 = vector.shape_cast %138 : vector<1x8x8xbf16> to vector<8x8xbf16>
    %cst_74 = arith.constant dense<0.000000e+00> : vector<64x8xf32>
    %140 = tpu.matmul %137, %139, %cst_74 {dimension_numbers = #tpu.dot_dimension_numbers<[1], [0], [0], [1], [0, 0, 1, 1], [], []>} : vector<64x8xbf16>, vector<8x8xbf16>, vector<64x8xf32> -> vector<64x8xf32>
    %141 = arith.addf %134, %140 : vector<64x8xf32>
    %142 = tpu.concatenate %74, %73, %74 in 1 : vector<8x1x8xf32>, vector<8x8x8xf32>, vector<8x1x8xf32> -> vector<8x10x8xf32>
    %143 = vector.extract_strided_slice %142 {offsets = [0, 0, 0], sizes = [8, 8, 8], strides = [1, 1, 1]} : vector<8x10x8xf32> to vector<8x8x8xf32>
    %144 = vector.shape_cast %143 : vector<8x8x8xf32> to vector<64x8xf32>
    %145 = arith.truncf %144 : vector<64x8xf32> to vector<64x8xbf16>
    %c9 = arith.constant 9 : index
    %c0_75 = arith.constant 0 : index
    %c0_76 = arith.constant 0 : index
    %146 = vector.load %arg4[%c9, %c0_75, %c0_76] : memref<12x8x8xbf16, #tpu.memory_space<vmem>>, vector<1x8x8xbf16>
    %147 = vector.shape_cast %146 : vector<1x8x8xbf16> to vector<8x8xbf16>
    %cst_77 = arith.constant dense<0.000000e+00> : vector<64x8xf32>
    %148 = tpu.matmul %145, %147, %cst_77 {dimension_numbers = #tpu.dot_dimension_numbers<[1], [0], [0], [1], [0, 0, 1, 1], [], []>} : vector<64x8xbf16>, vector<8x8xbf16>, vector<64x8xf32> -> vector<64x8xf32>
    %149 = arith.addf %141, %148 : vector<64x8xf32>
    %150 = vector.extract_strided_slice %142 {offsets = [0, 1, 0], sizes = [8, 8, 8], strides = [1, 1, 1]} : vector<8x10x8xf32> to vector<8x8x8xf32>
    %151 = vector.shape_cast %150 : vector<8x8x8xf32> to vector<64x8xf32>
    %152 = arith.truncf %151 : vector<64x8xf32> to vector<64x8xbf16>
    %c10 = arith.constant 10 : index
    %c0_78 = arith.constant 0 : index
    %c0_79 = arith.constant 0 : index
    %153 = vector.load %arg4[%c10, %c0_78, %c0_79] : memref<12x8x8xbf16, #tpu.memory_space<vmem>>, vector<1x8x8xbf16>
    %154 = vector.shape_cast %153 : vector<1x8x8xbf16> to vector<8x8xbf16>
    %cst_80 = arith.constant dense<0.000000e+00> : vector<64x8xf32>
    %155 = tpu.matmul %152, %154, %cst_80 {dimension_numbers = #tpu.dot_dimension_numbers<[1], [0], [0], [1], [0, 0, 1, 1], [], []>} : vector<64x8xbf16>, vector<8x8xbf16>, vector<64x8xf32> -> vector<64x8xf32>
    %156 = arith.addf %149, %155 : vector<64x8xf32>
    %157 = vector.extract_strided_slice %142 {offsets = [0, 2, 0], sizes = [8, 8, 8], strides = [1, 1, 1]} : vector<8x10x8xf32> to vector<8x8x8xf32>
    %158 = vector.shape_cast %157 : vector<8x8x8xf32> to vector<64x8xf32>
    %159 = arith.truncf %158 : vector<64x8xf32> to vector<64x8xbf16>
    %c11 = arith.constant 11 : index
    %c0_81 = arith.constant 0 : index
    %c0_82 = arith.constant 0 : index
    %160 = vector.load %arg4[%c11, %c0_81, %c0_82] : memref<12x8x8xbf16, #tpu.memory_space<vmem>>, vector<1x8x8xbf16>
    %161 = vector.shape_cast %160 : vector<1x8x8xbf16> to vector<8x8xbf16>
    %cst_83 = arith.constant dense<0.000000e+00> : vector<64x8xf32>
    %162 = tpu.matmul %159, %161, %cst_83 {dimension_numbers = #tpu.dot_dimension_numbers<[1], [0], [0], [1], [0, 0, 1, 1], [], []>} : vector<64x8xbf16>, vector<8x8xbf16>, vector<64x8xf32> -> vector<64x8xf32>
    %163 = arith.addf %156, %162 : vector<64x8xf32>
    %c0_84 = arith.constant 0 : index
    %c0_85 = arith.constant 0 : index
    %164 = vector.load %arg5[%c0_84, %c0_85] : memref<1x8xf32, #tpu.memory_space<vmem>>, vector<1x8xf32>
    %165 = vector.broadcast %164 : vector<1x8xf32> to vector<64x8xf32>
    %166 = arith.addf %163, %165 : vector<64x8xf32>
    %c0_86 = arith.constant 0 : index
    %c0_87 = arith.constant 0 : index
    %167 = vector.load %arg8[%c0_86, %c0_87] : memref<64x8xf32, #tpu.memory_space<vmem>>, vector<64x8xf32>
    tpu.vector_store %arg8[%c0_86, %c0_87], %166 {strides = array<i32>} : memref<64x8xf32, #tpu.memory_space<vmem>>, vector<64x8xf32>,
    return
  }
  func.func @transform_0(%arg0: i32, %arg1: i32) -> (i32, i32) {
    %c0_i32 = arith.constant 0 : i32
    %c0_i32_0 = arith.constant 0 : i32
    %c0_i32_1 = arith.constant 0 : i32
    return %c0_i32, %c0_i32_0 : i32, i32
  }
  func.func @transform_1(%arg0: i32, %arg1: i32) -> (i32, i32) {
    %c0_i32 = arith.constant 0 : i32
    %c0_i32_0 = arith.constant 0 : i32
    %c0_i32_1 = arith.constant 0 : i32
    return %c0_i32, %c0_i32_0 : i32, i32
  }
  func.func @transform_2(%arg0: i32, %arg1: i32) -> (i32, i32, i32) {
    %c0_i32 = arith.constant 0 : i32
    %c0_i32_0 = arith.constant 0 : i32
    %c0_i32_1 = arith.constant 0 : i32
    %c0_i32_2 = arith.constant 0 : i32
    return %c0_i32, %c0_i32_0, %c0_i32_1 : i32, i32, i32
  }
  func.func @transform_3(%arg0: i32, %arg1: i32) -> (i32, i32) {
    %c0_i32 = arith.constant 0 : i32
    %c0_i32_0 = arith.constant 0 : i32
    %c0_i32_1 = arith.constant 0 : i32
    return %c0_i32, %c0_i32_0 : i32, i32
  }
  func.func @transform_4(%arg0: i32, %arg1: i32) -> (i32, i32, i32) {
    %c1_i32 = arith.constant 1 : i32
    %0 = arith.muli %arg0, %c1_i32 : i32
    %1 = arith.addi %0, %arg1 : i32
    %c0_i32 = arith.constant 0 : i32
    %c0_i32_0 = arith.constant 0 : i32
    %c0_i32_1 = arith.constant 0 : i32
    return %1, %c0_i32, %c0_i32_0 : i32, i32, i32
  }
  func.func @transform_6(%arg0: i32, %arg1: i32) -> (i32, i32) {
    %c1_i32 = arith.constant 1 : i32
    %0 = arith.muli %arg0, %c1_i32 : i32
    %1 = arith.addi %0, %arg1 : i32
    %c0_i32 = arith.constant 0 : i32
    %c0_i32_0 = arith.constant 0 : i32
    return %1, %c0_i32 : i32, i32
  }
}

</mosaic_0001>

<bundles_post_ra>
// kernel: tile.19
= control target key start
LH: loop header
LB: loop body
LE: loop exit
PB: predicated region body
PF: predicated region fallthrough
CT: control target
= control target key end

     0   :  { %vm7_vm0 = vcmask 31744   ;;  %vm13_vm1 = vcmask 64544   ;;  %s39_s0 = inlined_call_operand.vmem [shape: f32[2,4], index: 0, kind: input, shape index: {}]   ;;  %s40_s1 = inlined_call_operand.vmem [shape: f32[1,8], index: 1, kind: output, shape index: {}]  }
   0x1   :  { %v4_v0 = vld [vmem:[%s39_s0] sm:$0x3]  ;;  %s22_s0 = smov 4  }
   0x2   :  { %5 = vst [vmem:[#allocation1] sm:$0x3] %v4_v0 }
   0x9   :  { %v10_v1 = vld [vmem:[#allocation1 + $0x1] sm:$0x1]   ;;  %v6_v2 = vld [vmem:[#allocation1] sm:$0x1]  }
   0xa   :  { %11 = vrot.lane.b32.xlu0 %v10_v1, %s22_s0  ;;  %8 = vst.msk [vmem:[#allocation0] sm:$0x1] %vm7_vm0, %v6_v2  }
  0x7c   :  { %v12_v3 = vpop.permute.xlu0 %11  }
  0x7d   :  { %14 = vst.msk [vmem:[#allocation0] sm:$0x1] %vm13_vm1, %v12_v3  }
  0x84   :  { %v17_v4 = vld [vmem:[#allocation0] sm:$0x1] }
  0x85   :  { %20 = vst [vmem:[%s40_s1] sm:$0x1] %v17_v4 }

// kernel: tile.18
= control target key start
LH: loop header
LB: loop body
LE: loop exit
PB: predicated region body
PF: predicated region fallthrough
CT: control target
= control target key end

     0   :  { %s22_s0 = inlined_call_operand.vmem [shape: f32[4], index: 0, kind: input, shape index: {}]   ;;  %s23_s1 = inlined_call_operand.vmem [shape: f32[2,4], index: 1, kind: output, shape index: {}]  }
   0x1   :  { %v4_v0 = vld [vmem:[%s22_s0] ss:$0 sm:$0xff] }
   0x2   :  { %5 = vst [vmem:[%s23_s1] sm:$0x3] %v4_v0 }

// kernel: downsampling_forward.1
= control target key start
LH: loop header
LB: loop body
LE: loop exit
PB: predicated region body
PF: predicated region fallthrough
CT: control target
= control target key end

     0   :  { %s1664_s21 = smov 0   ;;  %s1666_s22 = smov 0   ;;  %s2359_s0 = inlined_call_operand.vmem [shape: f32[1,8], index: 0, kind: input, shape index: {}]   ;;  %s2360_s1 = inlined_call_operand.vmem [shape: f32[1,8], index: 1, kind: input, shape index: {}]   ;;  %s2361_s2 = inlined_call_operand.vmem [shape: bf16[12,8,8], index: 2, kind: input, shape index: {}]   ;;  %s2362_s3 = inlined_call_operand.vmem [shape: f32[1,8], index: 3, kind: input, shape index: {}]   ;;  %s2363_s4 = inlined_call_operand.vmem [shape: f32[32,8,8], index: 4, kind: input, shape index: {}, may-alias: {4,5}]   ;;  %s2364_s5 = inlined_call_operand.vmem [shape: f32[32,8,8], index: 5, kind: input, shape index: {}, may-alias: {4,5}]   ;;  %s2365_s6 = inlined_call_operand.vmem [shape: f32[128,8], index: 6, kind: output, shape index: {}]  }
   0x1   :  { %s1668_s23 = smov 0  }
   0x2 LB: > { %s28_s24 = sadd.s32 1, %s1623_s22  ;;  %p1502_p0 = scmp.ge.s32.totalorder %s1627_s23, 1  ;;  %s1627_s23 = sphi %s1668_s23, %s16_s23   ;;  %s1623_s22 = sphi %s1666_s22, %s2367_s22   ;;  %s1619_s21 = sphi %s1664_s21, %s2366_s21  }
   0x3   : > { %p30_p1 = scmp.ge.s32.totalorder %s28_s24, 2  ;;  %p207_p2 = scmp.lt.s32.totalorder %s1627_s23, 3 }
   0x5   : > { %s2369_s24 = smov (%p30_p1, %s28_s24), 0  ;;  %p208_p3 = pnand %p1502_p0, %p207_p2 }
   0x6   : > { %s1503_s25 = sshll.u32 (!%p208_p3), %s1619_s21, 4  ;;  %s1505_s26 = sshll.u32 (!%p208_p3), %s1619_s21, 3 }
   0x7   : > { %211 = sbr.rel (%p208_p3) target bundleno = 382 (0x17e), region = 40  ;;  %p239_p4 = scmp.lt.s32.totalorder (!%p208_p3), %s1503_s25, 31 }
   0x8   : > { %p247_p5 = scmp.lt.s32.totalorder (!%p208_p3), %s1505_s26, 15  ;;  %s1508_s27 = sadd.s32 (!%p208_p3), 4294967295, %s1503_s25 }
   0x9   : > { %s260_s28 = sadd.s32 (!%p208_p3), 16, %s1503_s25  ;;  %p258_p6 = scmp.gt.s32.totalorder (!%p208_p3), %s1508_s27, %s1503_s25 }
   0xa   : > { %s261_s14 = sadd.s32 (!%p208_p3), 15, %s1503_s25 }
   0xb   : > { %p262_p7 = scmp.lt.s32.totalorder (!%p208_p3), %s260_s28, %s261_s14 }
   0xc   : > { %s240_s29 = scalar_select %p239_p4, %s1503_s25, 31 }
   0xd   : > { %s2371_s26 = smov (!%p247_p5, %s1505_s26), 15  ;;  %s2373_s27 = smov (!%p258_p6, %s1508_s27), %s1503_s25 }
   0xe   : > { %s1504_s30 = sshll.u32 %s240_s29, 3  ;;  %s1506_s10 = sshll.u32 %s2371_s26, 3 }
   0xf   : > { %s1685_s9 = scalar_lea.vmem %s2363_s4, %s1504_s30  ;;  %s1690_s13 = scalar_lea.vmem %s2365_s6, %s1506_s10 }
  0x10   : > { %s1509_s15 = sshll.u32 %s2373_s27, 3  ;;  %s2375_s28 = smov (!%p262_p7, %s260_s28), %s261_s14 }
  0x11   : > { %s265_s18 = scalar_lea.vmem %s2364_s5, %s1509_s15 }
  0x12   : > { %v1695_v0 = vld [vmem:[%s265_s18] sm:$0xff] }
  0x13   : > { %299 = vsyncadd [#allocation3], 128  ;;  %s1510_s19 = sshll.u32 %s2375_s28, 3 }
  0x14   : > { %s301_s26 = scalar_lea.vmem %s2364_s5, %s1510_s19 }
  0x15   : > { %v1700_v1 = vld [vmem:[%s301_s26] sm:$0xff] }
  0x16   : > { %337 = vsyncadd [#allocation3 + $0x1], 128  ;;  %v340_v2 = vld [vmem:[%s1685_s9] sm:$0xff]  ;;  %v341_v3 = vld [vmem:[%s1685_s9 + $0x8] sm:$0xff] }
  0x17   : > { %v342_v4 = vld [vmem:[%s1685_s9 + $0x10] sm:$0xff]  ;;  %v343_v5 = vld [vmem:[%s1685_s9 + $0x18] sm:$0xff]  ;;  %v344_v6 = vld [vmem:[%s1685_s9 + $0x20] sm:$0xff] }
  0x18   : > { %v345_v7 = vld [vmem:[%s1685_s9 + $0x28] sm:$0xff]  ;;  %v346_v8 = vld [vmem:[%s1685_s9 + $0x30] sm:$0xff]  ;;  %v347_v9 = vld [vmem:[%s1685_s9 + $0x38] sm:$0xff] }
  0x19   : > { %v348_v10 = vld [vmem:[%s1685_s9 + $0x40] sm:$0xff]  ;;  %v349_v11 = vld [vmem:[%s1685_s9 + $0x48] sm:$0xff]  ;;  %v350_v12 = vld [vmem:[%s1685_s9 + $0x50] sm:$0xff] }
  0x1a   : > { %v1716_v13 = vld [vmem:[%s2359_s0] ss:$0 sm:$0xff]  ;;  %v351_v14 = vld [vmem:[%s1685_s9 + $0x58] sm:$0xff]  ;;  %v353_v16 = vld [vmem:[%s1685_s9 + $0x68] sm:$0xff] }
  0x1b   : > { %v352_v15 = vld [vmem:[%s1685_s9 + $0x60] sm:$0xff]  ;;  %v354_v17 = vld [vmem:[%s1685_s9 + $0x70] sm:$0xff]  ;;  %v355_v18 = vld [vmem:[%s1685_s9 + $0x78] sm:$0xff]  ;;  %v359_v19 = vmul.f32 %v1716_v13, %v340_v2  ;;  %v360_v20 = vmul.f32 %v1716_v13, %v341_v3  ;;  %v361_v21 = vmul.f32 %v1716_v13, %v342_v4  ;;  %v362_v22 = vmul.f32 %v1716_v13, %v343_v5 }
  0x1c   : > { %v1730_v23 = vld [vmem:[%s2360_s1] ss:$0 sm:$0xff]  ;;  %v363_v24 = vmul.f32 %v1716_v13, %v344_v6  ;;  %v364_v25 = vmul.f32 %v1716_v13, %v345_v7  ;;  %v365_v26 = vmul.f32 %v1716_v13, %v346_v8  ;;  %v366_v27 = vmul.f32 %v1716_v13, %v347_v9 }
  0x1d   : > { %v367_v28 = vmul.f32 %v1716_v13, %v348_v10  ;;  %v368_v29 = vmul.f32 %v1716_v13, %v349_v11  ;;  %v369_v30 = vmul.f32 %v1716_v13, %v350_v12  ;;  %v370_v31 = vmul.f32 %v1716_v13, %v351_v14 }
  0x1e   : > { %v371_v32 = vmul.f32 %v1716_v13, %v352_v15  ;;  %v372_v33 = vmul.f32 %v1716_v13, %v353_v16  ;;  %v373_v34 = vmul.f32 %v1716_v13, %v354_v17  ;;  %v374_v35 = vmul.f32 %v1716_v13, %v355_v18 }
  0x1f   : > { %v378_v36 = vadd.f32 %v1730_v23, %v359_v19  ;;  %v379_v37 = vadd.f32 %v1730_v23, %v360_v20  ;;  %v380_v38 = vadd.f32 %v1730_v23, %v361_v21  ;;  %v1748_v39 = vadd.f32 %v1730_v23, %v362_v22 }
  0x20   : > { %v1751_v40 = vadd.f32 %v1730_v23, %v363_v24  ;;  %v1754_v41 = vadd.f32 %v1730_v23, %v364_v25  ;;  %v1757_v42 = vadd.f32 %v1730_v23, %v365_v26  ;;  %v1760_v43 = vadd.f32 %v1730_v23, %v366_v27 }
  0x21   : > { %v1763_v44 = vadd.f32 %v1730_v23, %v367_v28  ;;  %v1766_v45 = vadd.f32 %v1730_v23, %v368_v29  ;;  %v1769_v46 = vadd.f32 %v1730_v23, %v369_v30  ;;  %v1772_v47 = vadd.f32 %v1730_v23, %v370_v31 }
  0x22   : > { %v1775_v48 = vadd.f32 %v1730_v23, %v371_v32  ;;  %v1778_v49 = vadd.f32 %v1730_v23, %v372_v33  ;;  %v1781_v50 = vadd.f32 %v1730_v23, %v373_v34  ;;  %v1784_v51 = vadd.f32 %v1730_v23, %v374_v35 }
  0x23   : > { %v394_v52 = vmax.f32 %v378_v36, 0.0  ;;  %v395_v53 = vmax.f32 %v379_v37, 0.0  ;;  %v396_v54 = vmax.f32 %v380_v38, 0.0  ;;  %v397_v55 = vmax.f32 %v1748_v39, 0.0 }
  0x24   : > { %v398_v56 = vmax.f32 %v1751_v40, 0.0  ;;  %v399_v57 = vmax.f32 %v1754_v41, 0.0  ;;  %v400_v58 = vmax.f32 %v1757_v42, 0.0  ;;  %v401_v59 = vmax.f32 %v1760_v43, 0.0 }
  0x25   : > { %v402_v60 = vmax.f32 %v1763_v44, 0.0  ;;  %v403_v61 = vmax.f32 %v1766_v45, 0.0  ;;  %v404_v62 = vmax.f32 %v1769_v46, 0.0  ;;  %v405_v63 = vmax.f32 %v1772_v47, 0.0 }
  0x26   : > { %v406_v2 = vmax.f32 %v1775_v48, 0.0  ;;  %v407_v3 = vmax.f32 %v1778_v49, 0.0  ;;  %v408_v4 = vmax.f32 %v1781_v50, 0.0  ;;  %v409_v5 = vmax.f32 %v1784_v51, 0.0 }
  0x27   : > { %1613 = dma.done.wait [#allocation3], 128 }
  0x28   : > { %1614 = vsyncadd [#allocation3], 4294967168 }
  0x29   : > { %1615 = dma.done.wait [#allocation3 + $0x1], 128 }
  0x2a   : > { %1616 = vsyncadd [#allocation3 + $0x1], 4294967168  ;;  %v1799_v6 = vrot.slane %v394_v52, 7  ;;  %vm455_vm0 = vcmask 1040384   ;;  %v1801_v7 = vrot.slane %v396_v54, 7  ;;  %v417_v8 = vmul.f32 %v1716_v13, %v1695_v0 }
  0x2b   : > { %v440_v9 = vrot.slane %v395_v53, 7  ;;  %vm545_vm1 = vcmask 1043456   ;;  %vm532_vm2 = vcmask 64512   ;;  %v1525_v16 = vld [vmem:[%s2361_s2 + $0xc] sm:$0xf]  ;;  %vm493_vm3 = vcmask 1046528  }
  0x2c   : > { %v1807_v10 = vsel %vm455_vm0, 0.0, %v1799_v6  ;;  %v1811_v11 = vsel %vm455_vm0, 0.0, %v1801_v7  ;;  %v419_v12 = vadd.f32 %v1730_v23, %v417_v8  ;;  %v476_v17 = vld [vmem:[%s2361_s2] sm:$0xf]  ;;  %v1511_v19 = vld [vmem:[%s2361_s2 + $0x4] sm:$0xf] }
  0x2d   : > { %v1815_v14 = vsel %vm455_vm0, 0.0, %v440_v9  ;;  %v465_v15 = vsel %vm455_vm0, %v440_v9, 0.0  ;;  %v753_v18 = vpack.c.bf16 %v1811_v11, %v1807_v10  ;;  %v772_v20 = vsel %vm545_vm1, %v1525_v16, 0  ;;  %v1520_v25 = vld [vmem:[%s2361_s2 + $0x8] sm:$0xf] }
  0x2e   : > { %v497_v0 = vrot.slane %v1815_v14, 1  ;;  %v591_v21 = vsel %vm545_vm1, %v476_v17, 0  ;;  %v547_v22 = vsel %vm545_vm1, %v1511_v19, 0  ;;  %v421_v24 = vmax.f32 %v419_v12, 0.0  ;;  %781 = vmatpush.bf16.msra.mxu3 %v772_v20  ;;  %v1540_v28 = vld [vmem:[%s2361_s2 + $0x18] sm:$0xf] }
  0x2f   : > { %600 = vmatpush.bf16.msra.mxu1 %v591_v21  ;;  %v674_v26 = vsel %vm545_vm1, %v1520_v25, 0  ;;  %v498_v27 = vrot.slane %v465_v15, 1  ;;  %v1530_v29 = vld [vmem:[%s2361_s2 + $0x10] sm:$0xf]  ;;  %556 = vmatpush.bf16.msra.mxu0 %v547_v22  ;;  %v1031_v31 = vsel %vm545_vm1, %v1540_v28, 0  ;;  %v441_v36 = vrot.slane %v397_v55, 7 }
  0x30   : > { %v426_v30 = vmul.f32 0.0, %v421_v24  ;;  %683 = vmatpush.bf16.msra.mxu2 %v674_v26  ;;  %v878_v32 = vsel %vm545_vm1, %v1530_v29, 0  ;;  %v1545_v33 = vld [vmem:[%s2361_s2 + $0x1c] sm:$0xf]  ;;  %v1535_v35 = vld [vmem:[%s2361_s2 + $0x14] sm:$0xf] }
  0x31   : > { %v1095_v34 = vsel %vm545_vm1, %v1545_v33, 0  ;;  %1526 = vmatmul.msk.bf16.vlgmr.msra.gmra.mxu3 %vm532_vm2, %v753_v18  ;;  %v626_v38 = vrot.slane %v1815_v14, 2  ;;  %v627_v39 = vrot.slane %v465_v15, 2  ;;  %v968_v52 = vsel %vm545_vm1, %v1535_v35, 0 }
  0x32   : > { %v439_v37 = vrot.slane %v426_v30, 7  ;;  %v1856_v53 = vsel %vm493_vm3, %v497_v0, %v498_v27  ;;  %vm622_vm4 = vcmask 1045504   ;;  %1104 = vmatpush.bf16.msrb.mxu3 %v1095_v34  ;;  %v1861_v55 = vsel %vm455_vm0, 0.0, %v441_v36 }
  0x33   : > { %887 = vmatpush.bf16.msrb.mxu0 %v878_v32  ;;  %977 = vmatpush.bf16.msrb.mxu1 %v968_v52  ;;  %v466_v9 = vsel %vm455_vm0, %v441_v36, 0.0  ;;  %v1866_v0 = vsel %vm622_vm4, %v626_v38, %v627_v39  ;;  %v1870_v19 = vrot.slane %v398_v56, 7  ;;  %v1876_v21 = vrot.slane %v400_v58, 7 }
  0x34   : > { %1040 = vmatpush.bf16.msrb.mxu2 %v1031_v31  ;;  %v456_v54 = vsel %vm455_vm0, 0.0, %v439_v37  ;;  %v464_v8 = vsel %vm455_vm0, %v439_v37, 0.0  ;;  %v629_v22 = vrot.slane %v1861_v55, 2  ;;  %v630_v24 = vrot.slane %v466_v9, 2 }
  0x35   : > { %v472_v12 = vpack.c.bf16 %v1815_v14, %v456_v54  ;;  %v494_v15 = vrot.slane %v456_v54, 1  ;;  %v623_v16 = vrot.slane %v456_v54, 2  ;;  %v495_v17 = vrot.slane %v464_v8, 1 }
  0x36   : > { %v624_v18 = vrot.slane %v464_v8, 2  ;;  %v442_v40 = vrot.slane %v399_v57, 7  ;;  %v1885_v27 = vsel %vm622_vm4, %v629_v22, %v630_v24  ;;  %v1893_v58 = vsel %vm455_vm0, 0.0, %v1870_v19 }
  0x37   : > { %1516 = vmatmul.msk.bf16.vlgmr.msra.gmra.mxu1 %vm532_vm2, %v472_v12  ;;  %v496_v20 = vsel %vm493_vm3, %v494_v15, %v495_v17  ;;  %v1138_v42 = vpack.c.bf16 %v1885_v27, %v1866_v0  ;;  %v1897_v41 = vsel %vm455_vm0, 0.0, %v1876_v21  ;;  %v500_v30 = vrot.slane %v1861_v55, 1 }
  0x38   : > { %v526_v25 = vpack.c.bf16 %v1856_v53, %v496_v20  ;;  %v625_v26 = vsel %vm622_vm4, %v623_v16, %v624_v18  ;;  %v1900_v57 = vsel %vm455_vm0, 0.0, %v442_v40  ;;  %v467_v28 = vsel %vm455_vm0, %v442_v40, 0.0 }
  0x39   : > { %v655_v56 = vpack.c.bf16 %v1866_v0, %v625_v26  ;;  %v754_v29 = vpack.c.bf16 %v1897_v41, %v1893_v58  ;;  %v501_v31 = vrot.slane %v466_v9, 1  ;;  %v503_v32 = vrot.slane %v1900_v57, 1 }
  0x3a   : > { %1512 = vmatmul.msk.bf16.vlgmr.msra.gmra.mxu0 %vm532_vm2, %v526_v25  ;;  %v504_v33 = vrot.slane %v467_v28, 1  ;;  %v632_v34 = vrot.slane %v1900_v57, 2  ;;  %v633_v35 = vrot.slane %v467_v28, 2  ;;  %v473_v36 = vpack.c.bf16 %v1900_v57, %v1861_v55 }
  0x3b   : > { %1521 = vmatmul.msk.bf16.vlgmr.msra.gmra.mxu2 %vm532_vm2, %v655_v56  ;;  %v1912_v37 = vsel %vm493_vm3, %v500_v30, %v501_v31  ;;  %v1927_v8 = vrot.slane %v402_v60, 7  ;;  %v1931_v9 = vrot.slane %v404_v62, 7  ;;  %v443_v12 = vrot.slane %v401_v59, 7 }
  0x3c   : > { %v1915_v38 = vsel %vm493_vm3, %v503_v32, %v504_v33  ;;  %v1918_v39 = vsel %vm622_vm4, %v632_v34, %v633_v35  ;;  %v444_v15 = vrot.slane %v403_v61, 7  ;;  %v745_v16 = vsel %vm455_vm0, %v1799_v6, 0.0 }
  0x3d   : > { %v527_v52 = vpack.c.bf16 %v1915_v38, %v1912_v37  ;;  %v656_v54 = vpack.c.bf16 %v1918_v39, %v1885_v27  ;;  %v1943_v44 = vsel %vm455_vm0, 0.0, %v1927_v8  ;;  %v1947_v46 = vsel %vm455_vm0, 0.0, %v1931_v9 }
  0x3e   : > { %v1950_v43 = vsel %vm455_vm0, 0.0, %v443_v12  ;;  %v1953_v45 = vsel %vm455_vm0, 0.0, %v444_v15  ;;  %v468_v59 = vsel %vm455_vm0, %v443_v12, 0.0  ;;  %v469_v60 = vsel %vm455_vm0, %v444_v15, 0.0 }
  0x3f   : > { %v746_v61 = vsel %vm455_vm0, %v1801_v7, 0.0  ;;  %v917_v62 = vrot.slane %v1807_v10, 2  ;;  %v918_v6 = vrot.slane %v745_v16, 2  ;;  %v920_v17 = vrot.slane %v1811_v11, 2 }
  0x40   : > { %v755_v18 = vpack.c.bf16 %v1947_v46, %v1943_v44  ;;  %v506_v20 = vrot.slane %v1950_v43, 1  ;;  %v507_v22 = vrot.slane %v468_v59, 1  ;;  %v509_v24 = vrot.slane %v1953_v45, 1 }
  0x41   : > { %1527 = vmatmul.msk.bf16.gmra.mxu3 %vm532_vm2, %v754_v29  ;;  %v510_v25 = vrot.slane %v469_v60, 1  ;;  %v635_v26 = vrot.slane %v1950_v43, 2  ;;  %v636_v40 = vrot.slane %v468_v59, 2  ;;  %v638_v56 = vrot.slane %v1953_v45, 2 }
  0x42   : > { %v639_v7 = vrot.slane %v469_v60, 2  ;;  %v827_v28 = vrot.slane %v1807_v10, 1  ;;  %v1970_v29 = vsel %vm622_vm4, %v917_v62, %v918_v6  ;;  %v921_v30 = vrot.slane %v746_v61, 2 }
  0x43   : > { %v828_v31 = vrot.slane %v745_v16, 1  ;;  %v474_v32 = vpack.c.bf16 %v1953_v45, %v1950_v43  ;;  %v1975_v33 = vsel %vm493_vm3, %v506_v20, %v507_v22  ;;  %v1978_v34 = vsel %vm493_vm3, %v509_v24, %v510_v25  ;;  %v1565_v20 = vld [vmem:[%s2361_s2 + $0x2c] sm:$0xf] }
  0x44   : > { %v830_v35 = vrot.slane %v1811_v11, 1  ;;  %v1982_v10 = vsel %vm622_vm4, %v635_v26, %v636_v40  ;;  %v445_v12 = vrot.slane %v405_v63, 7  ;;  %v528_v16 = vpack.c.bf16 %v1978_v34, %v1975_v33  ;;  %v1555_v40 = vld [vmem:[%s2361_s2 + $0x24] sm:$0xf] }
  0x45   : > { %v2002_v59 = vrot.slane %v408_v4, 7  ;;  %v446_v60 = vrot.slane %v407_v3, 7  ;;  %v831_v62 = vrot.slane %v746_v61, 1  ;;  %v2010_v48 = vsel %vm493_vm3, %v827_v28, %v828_v31 }
  0x46   : > { %v470_v61 = vsel %vm455_vm0, %v445_v12, 0.0  ;;  %v1346_v26 = vsel %vm545_vm1, %v1565_v20, 0  ;;  %v1202_v0 = vpack.c.bf16 %v1943_v44, %v1897_v41 }
  0x47   : > { %1517 = vmatmul.msk.bf16.gmra.mxu1 %vm532_vm2, %v473_v36  ;;  %v1985_v36 = vsel %vm622_vm4, %v638_v56, %v639_v7  ;;  %v2013_v63 = vsel %vm493_vm3, %v830_v35, %v831_v62  ;;  %v2027_v3 = vsel %vm455_vm0, 0.0, %v2002_v59  ;;  %v2030_v4 = vsel %vm455_vm0, 0.0, %v446_v60  ;;  %1355 = vmatpush.bf16.msra.mxu3 %v1346_v26 }
  0x48   : > { %v657_v47 = vpack.c.bf16 %v1985_v36, %v1982_v10  ;;  %v859_v49 = vpack.c.bf16 %v2013_v63, %v2010_v48  ;;  %v471_v6 = vsel %vm455_vm0, %v446_v60, 0.0  ;;  %v513_v56 = vrot.slane %v470_v61, 1 }
  0x49   : > { %v515_v7 = vrot.slane %v2030_v4, 1  ;;  %v516_v28 = vrot.slane %v471_v6, 1  ;;  %v642_v35 = vrot.slane %v470_v61, 2  ;;  %v926_v61 = vrot.slane %v1897_v41, 2 }
  0x4a   : > { %1513 = vmatmul.msk.bf16.gmra.mxu0 %vm532_vm2, %v527_v52  ;;  %v1988_v52 = vsel %vm622_vm4, %v920_v17, %v921_v30  ;;  %v1560_v17 = vld [vmem:[%s2361_s2 + $0x28] sm:$0xf]  ;;  %v1220_v30 = vsel %vm545_vm1, %v1555_v40, 0  ;;  %v1008_v48 = vrot.slane %v409_v5, 7  ;;  %v752_v5 = vsel %vm455_vm0, %v2002_v59, 0.0 }
  0x4b   : > { %1522 = vmatmul.msk.bf16.gmra.mxu2 %vm532_vm2, %v656_v54  ;;  %v1992_v54 = vrot.slane %v406_v2, 7  ;;  %v949_v15 = vpack.c.bf16 %v1988_v52, %v1970_v29  ;;  %v2020_v2 = vsel %vm455_vm0, 0.0, %v445_v12  ;;  %v1284_v24 = vsel %vm545_vm1, %v1560_v17, 0  ;;  %1229 = vmatpush.bf16.msra.mxu1 %v1220_v30 }
  0x4c   : > { %v512_v22 = vrot.slane %v2020_v2, 1  ;;  %1293 = vmatpush.bf16.msra.mxu2 %v1284_v24  ;;  %v644_v12 = vrot.slane %v2030_v4, 2  ;;  %v2059_v62 = vsel %vm493_vm3, %v515_v7, %v516_v28  ;;  %v748_v17 = vsel %vm455_vm0, %v1876_v21, 0.0 }
  0x4d   : > { %v2017_v50 = vsel %vm455_vm0, 0.0, %v1992_v54  ;;  %v836_v28 = vrot.slane %v1897_v41, 1  ;;  %v751_v51 = vsel %vm455_vm0, %v1992_v54, 0.0  ;;  %v849_v59 = vrot.slane %v752_v5, 1 }
  0x4e   : > { %v756_v31 = vpack.c.bf16 %v2027_v3, %v2017_v50  ;;  %v514_v60 = vsel %vm493_vm3, %v512_v22, %v513_v56  ;;  %v927_v22 = vrot.slane %v748_v17, 2  ;;  %v833_v56 = vrot.slane %v1893_v58, 1 }
  0x4f   : > { %v846_v54 = vrot.slane %v751_v51, 1 }
  0x50   : > { %v2081_v21 = vsel %vm622_vm4, %v926_v61, %v927_v22  ;;  %v750_v61 = vsel %vm455_vm0, %v1931_v9, 0.0  ;;  %v842_v9 = vrot.slane %v1947_v46, 1 }
  0x51   : > { %1528 = vmatmul.msk.bf16.gmra.mxu3 %vm532_vm2, %v755_v18  ;;  %v1550_v18 = vld [vmem:[%s2361_s2 + $0x20] sm:$0xf] }
  0x52   : > { %v1157_v25 = vsel %vm545_vm1, %v1550_v18, 0  ;;  %v923_v18 = vrot.slane %v1893_v58, 2 }
  0x53   : > { %1166 = vmatpush.bf16.msra.mxu0 %v1157_v25 }
  0x57   : > { %1518 = vmatmul.msk.bf16.gmra.mxu1 %vm532_vm2, %v474_v32  ;;  %v641_v32 = vrot.slane %v2020_v2, 2 }
  0x59   : > { %v2071_v24 = vsel %vm622_vm4, %v641_v32, %v642_v35  ;;  %v837_v32 = vrot.slane %v748_v17, 1  ;;  %v749_v17 = vsel %vm455_vm0, %v1927_v8, 0.0 }
  0x5a   : > { %1514 = vmatmul.msk.bf16.gmra.mxu0 %vm532_vm2, %v528_v16  ;;  %v645_v16 = vrot.slane %v471_v6, 2  ;;  %v475_v6 = vpack.c.bf16 %v2030_v4, %v2020_v2  ;;  %v930_v22 = vrot.slane %v749_v17, 2  ;;  %v840_v8 = vrot.slane %v749_v17, 1 }
  0x5b   : > { %1523 = vmatmul.msk.bf16.gmra.mxu2 %vm532_vm2, %v657_v47  ;;  %v747_v47 = vsel %vm455_vm0, %v1870_v19, 0.0  ;;  %v529_v19 = vpack.c.bf16 %v2059_v62, %v514_v60  ;;  %v845_v17 = vrot.slane %v2017_v50, 1 }
  0x5c   : > { %v924_v20 = vrot.slane %v747_v47, 2  ;;  %v2074_v25 = vsel %vm622_vm4, %v644_v12, %v645_v16  ;;  %v834_v7 = vrot.slane %v747_v47, 1  ;;  %v2096_v12 = vsel %vm493_vm3, %v836_v28, %v837_v32 }
  0x5d   : > { %v658_v30 = vpack.c.bf16 %v2074_v25, %v2071_v24  ;;  %v1012_v28 = vpack.c.bf16 %v1861_v55, %v1815_v14  ;;  %v1077_v14 = vpack.c.bf16 %v1975_v33, %v1915_v38  ;;  %v1013_v55 = vpack.c.bf16 %v1950_v43, %v1900_v57 }
  0x5e   : > { %v2078_v26 = vsel %vm622_vm4, %v923_v18, %v924_v20  ;;  %v2093_v35 = vsel %vm493_vm3, %v833_v56, %v834_v7  ;;  %v1076_v18 = vpack.c.bf16 %v1912_v37, %v1856_v53  ;;  %v932_v20 = vrot.slane %v1947_v46, 2 }
  0x5f   : > { %v950_v40 = vpack.c.bf16 %v2081_v21, %v2078_v26  ;;  %v860_v16 = vpack.c.bf16 %v2096_v12, %v2093_v35  ;;  %v1265_v47 = vpack.c.bf16 %v2093_v35, %v2013_v63  ;;  %v839_v37 = vrot.slane %v1943_v44, 1 }
  0x60   : > { %v2155_v38 = vsel %vm455_vm0, 0.0, %v1008_v48  ;;  %v2158_v33 = vsel %vm455_vm0, %v1008_v48, 0.0  ;;  %v1014_v57 = vpack.c.bf16 %v2020_v2, %v1953_v45  ;;  %v938_v45 = vrot.slane %v2027_v3, 2 }
  0x61   : > { %1529 = vmatmul.msk.bf16.gmra.mxu3 %vm532_vm2, %v756_v31  ;;  %v1327_v31 = vpack.c.bf16 %v2078_v26, %v1988_v52  ;;  %v2130_v32 = vsel %vm493_vm3, %v839_v37, %v840_v8  ;;  %v1072_v43 = vrot.slane %v2155_v38, 1  ;;  %v939_v2 = vrot.slane %v752_v5, 2 }
  0x62   : > { %v1015_v8 = vpack.c.bf16 %v2155_v38, %v2030_v4  ;;  %v1203_v5 = vpack.c.bf16 %v2017_v50, %v1947_v46 }
  0x67   : > { %1519 = vmatmul.msk.bf16.gmra.mxu1 %vm532_vm2, %v475_v6  ;;  %v929_v6 = vrot.slane %v1943_v44, 2 }
  0x69   : > { %v2114_v56 = vsel %vm622_vm4, %v929_v6, %v930_v22 }
  0x6a   : > { %1515 = vmatmul.msk.bf16.gmra.mxu0 %vm532_vm2, %v529_v19  ;;  %v933_v19 = vrot.slane %v750_v61, 2 }
  0x6b   : > { %1524 = vmatmul.msk.bf16.gmra.mxu2 %vm532_vm2, %v658_v30  ;;  %v843_v30 = vrot.slane %v750_v61, 1  ;;  %v848_v61 = vrot.slane %v2027_v3, 1 }
  0x6c   : > { %v2117_v7 = vsel %vm622_vm4, %v932_v20, %v933_v19  ;;  %v2179_v20 = vsel %vm622_vm4, %v938_v45, %v939_v2  ;;  %v2184_v19 = vsel %vm493_vm3, %v845_v17, %v846_v54 }
  0x6d   : > { %v951_v53 = vpack.c.bf16 %v2117_v7, %v2114_v56 }
  0x71   : > { %1546 = vmatmul.msk.bf16.vlgmr.msrb.gmra.mxu3 %vm532_vm2, %v1076_v18  ;;  %v2133_v18 = vsel %vm493_vm3, %v842_v9, %v843_v30  ;;  %v1266_v9 = vpack.c.bf16 %v2130_v32, %v2096_v12 }
  0x72   : > { %v861_v29 = vpack.c.bf16 %v2133_v18, %v2130_v32  ;;  %v418_v32 = vmul.f32 %v1716_v13, %v1700_v1  ;;  %v1267_v54 = vpack.c.bf16 %v2184_v19, %v2133_v18  ;;  %v1134_v18 = vrot.slane %v2155_v38, 2 }
  0x77   : > { %1536 = vmatmul.msk.bf16.vlgmr.msrb.gmra.mxu1 %vm532_vm2, %v949_v15  ;;  %v1078_v15 = vpack.c.bf16 %v514_v60, %v1978_v34  ;;  %v1073_v34 = vrot.slane %v2158_v33, 1  ;;  %v935_v60 = vrot.slane %v2017_v50, 2 }
  0x7a   : > { %1531 = vmatmul.msk.bf16.vlgmr.msrb.gmra.mxu0 %vm532_vm2, %v859_v49  ;;  %v1074_v49 = vsel %vm493_vm3, %v1072_v43, %v1073_v34 }
  0x7b   : > { %1541 = vmatmul.msk.bf16.vlgmr.msrb.gmra.mxu2 %vm532_vm2, %v1012_v28 }
  0x81   : > { %1547 = vmatmul.msk.bf16.gmra.mxu3 %vm532_vm2, %v1077_v14 }
  0x87   : > { %1537 = vmatmul.msk.bf16.gmra.mxu1 %vm532_vm2, %v950_v40  ;;  %v936_v40 = vrot.slane %v751_v51, 2 }
  0x89   : > { %v937_v6 = vsel %vm622_vm4, %v935_v60, %v936_v40 }
  0x8a   : > { %1532 = vmatmul.msk.bf16.gmra.mxu0 %vm532_vm2, %v860_v16  ;;  %v1079_v16 = vpack.c.bf16 %v1074_v49, %v2059_v62  ;;  %v952_v22 = vpack.c.bf16 %v2179_v20, %v937_v6  ;;  %v2187_v62 = vsel %vm493_vm3, %v848_v61, %v849_v59 }
  0x8b   : > { %1542 = vmatmul.msk.bf16.gmra.mxu2 %vm532_vm2, %v1013_v55  ;;  %v862_v37 = vpack.c.bf16 %v2187_v62, %v2184_v19  ;;  %v1135_v19 = vrot.slane %v2158_v33, 2 }
  0x91   : > { %1548 = vmatmul.msk.bf16.gmra.mxu3 %vm532_vm2, %v1078_v15 }
  0x97   : > { %1538 = vmatmul.msk.bf16.gmra.mxu1 %vm532_vm2, %v951_v53  ;;  %v1328_v53 = vpack.c.bf16 %v2114_v56, %v2081_v21  ;;  %v1201_v21 = vpack.c.bf16 %v1893_v58, %v1811_v11 }
  0x9a   : > { %1533 = vmatmul.msk.bf16.gmra.mxu0 %vm532_vm2, %v861_v29 }
  0x9b   : > { %1543 = vmatmul.msk.bf16.gmra.mxu2 %vm532_vm2, %v1014_v57  ;;  %v1329_v57 = vpack.c.bf16 %v937_v6, %v2117_v7  ;;  %v1140_v7 = vpack.c.bf16 %v2071_v24, %v1985_v36 }
  0xa1   : > { %1549 = vmatmul.msk.bf16.gmra.mxu3 %vm532_vm2, %v1079_v16 }
  0xa7   : > { %1539 = vmatmul.msk.bf16.gmra.mxu1 %vm532_vm2, %v952_v22 }
  0xaa   : > { %1534 = vmatmul.msk.bf16.gmra.mxu0 %vm532_vm2, %v862_v37 }
  0xab   : > { %1544 = vmatmul.msk.bf16.gmra.mxu2 %vm532_vm2, %v1015_v8 }
  0xb1   : > { %1566 = vmatmul.msk.bf16.vlgmr.msra.gmra.mxu3 %vm532_vm2, %v1327_v31 }
  0xb4   : > { %v602_v56 = vpop.f32.mrf.mxu1  ;;  %v783_v28 = vpop.f32.mrf.mxu3 }
  0xb7   : > { %v558_v30 = vpop.f32.mrf.mxu0  ;;  %1556 = vmatmul.msk.bf16.vlgmr.msra.gmra.mxu1 %vm532_vm2, %v1201_v21 }
  0xb8   : > { %v603_v4 = vadd.f32 %v602_v56, %v558_v30 }
  0xba   : > { %1551 = vmatmul.msk.bf16.vlgmr.msra.gmra.mxu0 %vm532_vm2, %v1138_v42  ;;  %v420_v42 = vadd.f32 %v1730_v23, %v418_v32 }
  0xbb   : > { %1561 = vmatmul.msk.bf16.vlgmr.msra.gmra.mxu2 %vm532_vm2, %v1265_v47  ;;  %v1139_v47 = vpack.c.bf16 %v1982_v10, %v1918_v39 }
  0xbc   : > { %v604_v52 = vpop.f32.mrf.mxu1  ;;  %v785_v26 = vpop.f32.mrf.mxu3  ;;  %v422_v13 = vmax.f32 %v420_v42, 0.0 }
  0xbe   : > { %v685_v31 = vpop.f32.mrf.mxu2  ;;  %v430_v44 = vmul.f32 0.0, %v422_v13 }
  0xbf   : > { %v705_v11 = vadd.f32 %v685_v31, %v603_v4  ;;  %v560_v58 = vpop.f32.mrf.mxu0  ;;  %v1136_v4 = vsel %vm622_vm4, %v1134_v18, %v1135_v19 }
  0xc0   : > { %v605_v12 = vadd.f32 %v604_v52, %v560_v58  ;;  %v1197_v34 = vrot.slane %v430_v44, 7  ;;  %v1141_v38 = vpack.c.bf16 %v1136_v4, %v2074_v25 }
  0xc1   : > { %v2217_v29 = vadd.f32 %v783_v28, %v705_v11  ;;  %1567 = vmatmul.msk.bf16.gmra.mxu3 %vm532_vm2, %v1328_v53 }
  0xc2   : > { %v1199_v60 = vsel %vm455_vm0, 0.0, %v1197_v34  ;;  %v1200_v40 = vsel %vm455_vm0, %v1197_v34, 0.0 }
  0xc3   : > { %v1323_v61 = vrot.slane %v1199_v60, 2  ;;  %v1324_v59 = vrot.slane %v1200_v40, 2  ;;  %v1261_v21 = vrot.slane %v1199_v60, 1  ;;  %v1262_v56 = vrot.slane %v1200_v40, 1 }
  0xc4   : > { %v607_v27 = vpop.f32.mrf.mxu1  ;;  %v788_v63 = vpop.f32.mrf.mxu3  ;;  %v1204_v30 = vpack.c.bf16 %v1199_v60, %v2027_v3 }
  0xc5   : > { %v1325_v6 = vsel %vm622_vm4, %v1323_v61, %v1324_v59 }
  0xc6   : > { %v687_v35 = vpop.f32.mrf.mxu2  ;;  %v1330_v53 = vpack.c.bf16 %v1325_v6, %v2179_v20  ;;  %v1263_v20 = vsel %vm493_vm3, %v1261_v21, %v1262_v56 }
  0xc7   : > { %v706_v14 = vadd.f32 %v687_v35, %v605_v12  ;;  %v563_v55 = vpop.f32.mrf.mxu0  ;;  %1557 = vmatmul.msk.bf16.gmra.mxu1 %vm532_vm2, %v1202_v0  ;;  %v1268_v58 = vpack.c.bf16 %v1263_v20, %v2187_v62 }
  0xc8   : > { %v608_v1 = vadd.f32 %v607_v27, %v563_v55 }
  0xc9   : > { %v2226_v15 = vadd.f32 %v785_v26, %v706_v14 }
  0xca   : > { %1552 = vmatmul.msk.bf16.gmra.mxu0 %vm532_vm2, %v1139_v47 }
  0xcb   : > { %1562 = vmatmul.msk.bf16.gmra.mxu2 %vm532_vm2, %v1266_v9 }
  0xcc   : > { %v609_v41 = vpop.f32.mrf.mxu1  ;;  %v790_v23 = vpop.f32.mrf.mxu3 }
  0xce   : > { %v690_v48 = vpop.f32.mrf.mxu2 }
  0xcf   : > { %v707_v43 = vadd.f32 %v690_v48, %v608_v1  ;;  %v565_v39 = vpop.f32.mrf.mxu0 }
  0xd0   : > { %v610_v10 = vadd.f32 %v609_v41, %v565_v39 }
  0xd1   : > { %v2231_v51 = vadd.f32 %v788_v63, %v707_v43  ;;  %1568 = vmatmul.msk.bf16.gmra.mxu3 %vm532_vm2, %v1329_v57 }
  0xd4   : > { %v612_v49 = vpop.f32.mrf.mxu1  ;;  %v793_v45 = vpop.f32.mrf.mxu3 }
  0xd6   : > { %v692_v2 = vpop.f32.mrf.mxu2 }
  0xd7   : > { %v708_v16 = vadd.f32 %v692_v2, %v610_v10  ;;  %v568_v17 = vpop.f32.mrf.mxu0  ;;  %1558 = vmatmul.msk.bf16.gmra.mxu1 %vm532_vm2, %v1203_v5 }
  0xd8   : > { %v613_v46 = vadd.f32 %v612_v49, %v568_v17 }
  0xd9   : > { %v2243_v50 = vadd.f32 %v790_v23, %v708_v16 }
  0xda   : > { %1553 = vmatmul.msk.bf16.gmra.mxu0 %vm532_vm2, %v1140_v7 }
  0xdb   : > { %1563 = vmatmul.msk.bf16.gmra.mxu2 %vm532_vm2, %v1267_v54 }
  0xdc   : > { %v614_v22 = vpop.f32.mrf.mxu1  ;;  %v795_v36 = vpop.f32.mrf.mxu3 }
  0xde   : > { %v695_v24 = vpop.f32.mrf.mxu2 }
  0xdf   : > { %v709_v37 = vadd.f32 %v695_v24, %v613_v46  ;;  %v570_v8 = vpop.f32.mrf.mxu0 }
  0xe0   : > { %v615_v9 = vadd.f32 %v614_v22, %v570_v8 }
  0xe1   : > { %v2251_v28 = vadd.f32 %v793_v45, %v709_v37  ;;  %1569 = vmatmul.msk.bf16.gmra.mxu3 %vm532_vm2, %v1330_v53 }
  0xe4   : > { %v617_v52 = vpop.f32.mrf.mxu1  ;;  %v798_v26 = vpop.f32.mrf.mxu3 }
  0xe6   : > { %v697_v31 = vpop.f32.mrf.mxu2 }
  0xe7   : > { %v710_v11 = vadd.f32 %v697_v31, %v615_v9  ;;  %v573_v33 = vpop.f32.mrf.mxu0  ;;  %1559 = vmatmul.msk.bf16.gmra.mxu1 %vm532_vm2, %v1204_v30 }
  0xe8   : > { %v618_v12 = vadd.f32 %v617_v52, %v573_v33 }
  0xe9   : > { %v2260_v32 = vadd.f32 %v795_v36, %v710_v11 }
  0xea   : > { %1554 = vmatmul.msk.bf16.gmra.mxu0 %vm532_vm2, %v1141_v38 }
  0xeb   : > { %1564 = vmatmul.msk.bf16.gmra.mxu2 %vm532_vm2, %v1268_v58 }
  0xec   : > { %v619_v3 = vpop.f32.mrf.mxu1  ;;  %v800_v0 = vpop.f32.mrf.mxu3 }
  0xee   : > { %v700_v27 = vpop.f32.mrf.mxu2 }
  0xef   : > { %v711_v42 = vadd.f32 %v700_v27, %v618_v12  ;;  %v575_v63 = vpop.f32.mrf.mxu0 }
  0xf0   : > { %v620_v35 = vadd.f32 %v619_v3, %v575_v63 }
  0xf1   : > { %v2264_v25 = vadd.f32 %v798_v26, %v711_v42 }
  0xf4   : > { %v979_v47 = vpop.f32.mrf.mxu1  ;;  %v1106_v14 = vpop.f32.mrf.mxu3 }
  0xf6   : > { %v702_v55 = vpop.f32.mrf.mxu2 }
  0xf7   : > { %v712_v1 = vadd.f32 %v702_v55, %v620_v35  ;;  %v889_v62 = vpop.f32.mrf.mxu0 }
  0xf8   : > { %v909_v24 = vadd.f32 %v889_v62, %v2217_v29 }
  0xf9   : > { %v2266_v13 = vadd.f32 %v800_v0, %v712_v1 }
  0xfa   : > { %v999_v18 = vadd.f32 %v979_v47, %v909_v24 }
  0xfc   : > { %v981_v41 = vpop.f32.mrf.mxu1  ;;  %v1108_v44 = vpop.f32.mrf.mxu3 }
  0xfe   : > { %v1042_v23 = vpop.f32.mrf.mxu2 }
  0xff   : > { %v891_v48 = vpop.f32.mrf.mxu0  ;;  %v1062_v19 = vadd.f32 %v1042_v23, %v999_v18 }
 0x100   : > { %v910_v21 = vadd.f32 %v891_v48, %v2226_v15  ;;  %v2304_v15 = vld [vmem:[%s2362_s3] ss:$0 sm:$0xff] }
 0x101   : > { %v1126_v4 = vadd.f32 %v1106_v14, %v1062_v19 }
 0x102   : > { %v1000_v20 = vadd.f32 %v981_v41, %v910_v21 }
 0x104   : > { %v984_v57 = vpop.f32.mrf.mxu1  ;;  %v1111_v43 = vpop.f32.mrf.mxu3 }
 0x106   : > { %v1044_v39 = vpop.f32.mrf.mxu2 }
 0x107   : > { %v894_v10 = vpop.f32.mrf.mxu0  ;;  %v1063_v31 = vadd.f32 %v1044_v39, %v1000_v20 }
 0x108   : > { %v911_v38 = vadd.f32 %v894_v10, %v2231_v51 }
 0x109   : > { %v1127_v3 = vadd.f32 %v1108_v44, %v1063_v31 }
 0x10a   : > { %v1001_v27 = vadd.f32 %v984_v57, %v911_v38 }
 0x10c   : > { %v986_v34 = vpop.f32.mrf.mxu1  ;;  %v2268_v5 = vpop.f32.mrf.mxu3 }
 0x10e   : > { %v1047_v49 = vpop.f32.mrf.mxu2 }
 0x10f   : > { %v896_v60 = vpop.f32.mrf.mxu0  ;;  %v1064_v35 = vadd.f32 %v1047_v49, %v1001_v27 }
 0x110   : > { %v912_v51 = vadd.f32 %v896_v60, %v2243_v50 }
 0x111   : > { %v1128_v23 = vadd.f32 %v1111_v43, %v1064_v35 }
 0x112   : > { %v1002_v44 = vadd.f32 %v986_v34, %v912_v51 }
 0x114   : > { %v2270_v40 = vpop.f32.mrf.mxu1  ;;  %v2272_v45 = vpop.f32.mrf.mxu3 }
 0x116   : > { %v1049_v2 = vpop.f32.mrf.mxu2 }
 0x117   : > { %v899_v7 = vpop.f32.mrf.mxu0  ;;  %v1065_v10 = vadd.f32 %v1049_v2, %v1002_v44 }
 0x118   : > { %v913_v18 = vadd.f32 %v899_v7, %v2251_v28 }
 0x11a   : > { %v1003_v34 = vadd.f32 %v2270_v40, %v913_v18 }
 0x11c   : > { %v2274_v16 = vpop.f32.mrf.mxu1  ;;  %v2276_v17 = vpop.f32.mrf.mxu3 }
 0x11e   : > { %v1052_v54 = vpop.f32.mrf.mxu2 }
 0x11f   : > { %v2278_v61 = vpop.f32.mrf.mxu0  ;;  %v1066_v2 = vadd.f32 %v1052_v54, %v1003_v34 }
 0x120   : > { %v914_v28 = vadd.f32 %v2278_v61, %v2260_v32 }
 0x122   : > { %v1004_v40 = vadd.f32 %v2274_v16, %v914_v28 }
 0x124   : > { %v2280_v59 = vpop.f32.mrf.mxu1  ;;  %v2282_v46 = vpop.f32.mrf.mxu3 }
 0x126   : > { %v2284_v6 = vpop.f32.mrf.mxu2 }
 0x127   : > { %v2286_v22 = vpop.f32.mrf.mxu0 }
 0x128   : > { %v915_v32 = vadd.f32 %v2286_v22, %v2264_v25 }
 0x12a   : > { %v1005_v27 = vadd.f32 %v2280_v59, %v915_v32 }
 0x12c   : > { %v2288_v36 = vpop.f32.mrf.mxu1  ;;  %v2291_v53 = vpop.f32.mrf.mxu3 }
 0x12e   : > { %v2293_v37 = vpop.f32.mrf.mxu2 }
 0x12f   : > { %v2295_v8 = vpop.f32.mrf.mxu0 }
 0x130   : > { %v916_v25 = vadd.f32 %v2295_v8, %v2266_v13 }
 0x132   : > { %v1006_v59 = vadd.f32 %v2288_v36, %v916_v25 }
 0x134   : > { %v1231_v9 = vpop.f32.mrf.mxu1  ;;  %v1357_v56 = vpop.f32.mrf.mxu3 }
 0x136   : > { %v2298_v30 = vpop.f32.mrf.mxu2 }
 0x137   : > { %v1168_v52 = vpop.f32.mrf.mxu0 }
 0x138   : > { %v1188_v26 = vadd.f32 %v1168_v52, %v1126_v4 }
 0x13a   : > { %v1251_v11 = vadd.f32 %v1231_v9, %v1188_v26  ;;  %v1129_v9 = vadd.f32 %v2268_v5, %v1065_v10  ;;  %v1130_v5 = vadd.f32 %v2272_v45, %v1066_v2 }
 0x13c   : > { %v1233_v29 = vpop.f32.mrf.mxu1  ;;  %v1359_v33 = vpop.f32.mrf.mxu3 }
 0x13e   : > { %v1295_v58 = vpop.f32.mrf.mxu2 }
 0x13f   : > { %v1315_v12 = vadd.f32 %v1295_v58, %v1251_v11  ;;  %v1170_v0 = vpop.f32.mrf.mxu0 }
 0x140   : > { %v1189_v63 = vadd.f32 %v1170_v0, %v1127_v3 }
 0x141   : > { %v1377_v42 = vadd.f32 %v1357_v56, %v1315_v12 }
 0x142   : > { %v1252_v55 = vadd.f32 %v1233_v29, %v1189_v63 }
 0x143   : > { %v1389_v47 = vadd.f32 %v2304_v15, %v1377_v42 }
 0x144   : > { %v1236_v14 = vpop.f32.mrf.mxu1  ;;  %v1362_v62 = vpop.f32.mrf.mxu3 }
 0x145   : > { %1397 = vst.msk [vmem:[%s1690_s13] sm:$0xff] %vm532_vm2, %v1389_v47 }
 0x146   : > { %v1297_v1 = vpop.f32.mrf.mxu2 }
 0x147   : > { %v1316_v41 = vadd.f32 %v1297_v1, %v1252_v55  ;;  %v1173_v48 = vpop.f32.mrf.mxu0 }
 0x148   : > { %v1190_v57 = vadd.f32 %v1173_v48, %v1128_v23 }
 0x149   : > { %v1378_v39 = vadd.f32 %v1359_v33, %v1316_v41  ;;  %v1067_v33 = vadd.f32 %v2284_v6, %v1004_v40  ;;  %v1068_v6 = vadd.f32 %v2293_v37, %v1005_v27  ;;  %v1069_v41 = vadd.f32 %v2298_v30, %v1006_v59 }
 0x14a   : > { %v1253_v50 = vadd.f32 %v1236_v14, %v1190_v57 }
 0x14b   : > { %v1390_v49 = vadd.f32 %v2304_v15, %v1378_v39  ;;  %v1131_v45 = vadd.f32 %v2276_v17, %v1067_v33  ;;  %v1132_v51 = vadd.f32 %v2282_v46, %v1068_v6  ;;  %v1133_v46 = vadd.f32 %v2291_v53, %v1069_v41 }
 0x14c   : > { %v1238_v24 = vpop.f32.mrf.mxu1  ;;  %v1364_v43 = vpop.f32.mrf.mxu3 }
 0x14d   : > { %1398 = vst.msk [vmem:[%s1690_s13 + $0x8] sm:$0xff] %vm532_vm2, %v1390_v49 }
 0x14e   : > { %v1300_v60 = vpop.f32.mrf.mxu2 }
 0x14f   : > { %v1317_v19 = vadd.f32 %v1300_v60, %v1253_v50  ;;  %v1175_v21 = vpop.f32.mrf.mxu0 }
 0x150   : > { %v1191_v4 = vadd.f32 %v1175_v21, %v1129_v9 }
 0x151   : > { %v1379_v56 = vadd.f32 %v1362_v62, %v1317_v19 }
 0x152   : > { %v1254_v7 = vadd.f32 %v1238_v24, %v1191_v4 }
 0x153   : > { %v1391_v52 = vadd.f32 %v2304_v15, %v1379_v56 }
 0x154   : > { %v1241_v20 = vpop.f32.mrf.mxu1  ;;  %v1367_v54 = vpop.f32.mrf.mxu3 }
 0x155   : > { %1399 = vst.msk [vmem:[%s1690_s13 + $0x10] sm:$0xff] %vm532_vm2, %v1391_v52 }
 0x156   : > { %v1302_v26 = vpop.f32.mrf.mxu2 }
 0x157   : > { %v1318_v31 = vadd.f32 %v1302_v26, %v1254_v7  ;;  %v1178_v29 = vpop.f32.mrf.mxu0 }
 0x158   : > { %v1192_v11 = vadd.f32 %v1178_v29, %v1130_v5 }
 0x159   : > { %v1380_v38 = vadd.f32 %v1364_v43, %v1318_v31 }
 0x15a   : > { %v1255_v61 = vadd.f32 %v1241_v20, %v1192_v11 }
 0x15b   : > { %v1392_v58 = vadd.f32 %v2304_v15, %v1380_v38 }
 0x15c   : > { %v1243_v16 = vpop.f32.mrf.mxu1  ;;  %v1369_v47 = vpop.f32.mrf.mxu3 }
 0x15d   : > { %1400 = vst.msk [vmem:[%s1690_s13 + $0x18] sm:$0xff] %vm532_vm2, %v1392_v58 }
 0x15e   : > { %v1305_v12 = vpop.f32.mrf.mxu2 }
 0x15f   : > { %v1319_v3 = vadd.f32 %v1305_v12, %v1255_v61  ;;  %v1180_v0 = vpop.f32.mrf.mxu0 }
 0x160   : > { %v1193_v63 = vadd.f32 %v1180_v0, %v1131_v45 }
 0x161   : > { %v1381_v42 = vadd.f32 %v1367_v54, %v1319_v3 }
 0x162   : > { %v1256_v22 = vadd.f32 %v1243_v16, %v1193_v63 }
 0x163   : > { %v1393_v35 = vadd.f32 %v2304_v15, %v1381_v42 }
 0x164   : > { %v1246_v62 = vpop.f32.mrf.mxu1  ;;  %v1372_v8 = vpop.f32.mrf.mxu3 }
 0x165   : > { %1401 = vst.msk [vmem:[%s1690_s13 + $0x20] sm:$0xff] %vm532_vm2, %v1393_v35 }
 0x166   : > { %v1307_v14 = vpop.f32.mrf.mxu2 }
 0x167   : > { %v1320_v17 = vadd.f32 %v1307_v14, %v1256_v22  ;;  %v1183_v55 = vpop.f32.mrf.mxu0 }
 0x168   : > { %v1194_v37 = vadd.f32 %v1183_v55, %v1132_v51 }
 0x169   : > { %v1382_v1 = vadd.f32 %v1369_v47, %v1320_v17 }
 0x16a   : > { %v1257_v13 = vadd.f32 %v1246_v62, %v1194_v37 }
 0x16b   : > { %v1394_v23 = vadd.f32 %v2304_v15, %v1382_v1 }
 0x16c   : > { %v1248_v49 = vpop.f32.mrf.mxu1  ;;  %v1374_v50 = vpop.f32.mrf.mxu3 }
 0x16d   : > { %1402 = vst.msk [vmem:[%s1690_s13 + $0x28] sm:$0xff] %vm532_vm2, %v1394_v23 }
 0x16e   : > { %v1310_v48 = vpop.f32.mrf.mxu2 }
 0x16f   : > { %v1321_v44 = vadd.f32 %v1310_v48, %v1257_v13  ;;  %v1185_v39 = vpop.f32.mrf.mxu0 }
 0x170   : > { %v1195_v36 = vadd.f32 %v1185_v39, %v1133_v46 }
 0x171   : > { %v1383_v57 = vadd.f32 %v1372_v8, %v1321_v44 }
 0x172   : > { %v1258_v30 = vadd.f32 %v1248_v49, %v1195_v36 }
 0x173   : > { %v1395_v10 = vadd.f32 %v2304_v15, %v1383_v57 }
 0x175   : > { %1403 = vst.msk [vmem:[%s1690_s13 + $0x30] sm:$0xff] %vm532_vm2, %v1395_v10 }
 0x176   : > { %v1312_v24 = vpop.f32.mrf.mxu2 }
 0x177   : > { %v1322_v18 = vadd.f32 %v1312_v24, %v1258_v30 }
 0x179   : > { %v1384_v60 = vadd.f32 %v1374_v50, %v1322_v18 }
 0x17b   : > { %v1396_v19 = vadd.f32 %v2304_v15, %v1384_v60 }
 0x17d   : > { %1404 = vst.msk [vmem:[%s1690_s13 + $0x38] sm:$0xff] %vm532_vm2, %v1396_v19 }
 0x17e PF: > { %s16_s23 = sadd.s32 1, %s1627_s23   ;;  %s2366_s21 = smov %s1623_s22 }
 0x17f   : > { %p13_p8 = scmp.ge.s32.totalorder %s16_s23, 4   ;;  %s2367_s22 = smov %s2369_s24 }
 0x181   :  { %15 = sbr.rel (!%p13_p8) target bundleno = 2 (0x2), region = 162 }
 0x186   :  { %1430 = vsyncmov [#allocation3] }
 0x189   :  { %s1431_s12 = vpop.sfrf %1430 }
 0x18a   :  { %p1572_p9 = scmp.ne.s32.totalorder %s1431_s12, 0 }
 0x18c   :  { %1435 = shalt.err (%p1572_p9)  }
 0x18d   :  { %1437 = vsyncmov [#allocation3 + $0x1] }
 0x190   :  { %s1438_s14 = vpop.sfrf %1437 }
 0x191   :  { %p1573_p10 = scmp.ne.s32.totalorder %s1438_s14, 0 }
 0x193   :  { %1442 = shalt.err (%p1573_p10)  }

</bundles_post_ra>
